<compile_context>
chip_gen: v5e
topology: v5e:2x2
jax: 0.10.0
libtpu: 0.0.40
codegen_flags: <defaults>
</compile_context>

<pallas_src>
import functools

import jax
import jax.numpy as jnp
from jax.experimental import pallas as pl
from jax.experimental.pallas import tpu as pltpu

_VMEM_LIMIT = 48 * 1024 * 1024  # leave headroom under v7x's 64 MiB physical VMEM

# ----------------------------------------------------------------------------
# EfficientNetV2-L architecture config (torchvision):
# (block_type, expand_ratio, stride, in_ch, out_ch, num_layers)
STAGES = [
    ("fused", 1, 1, 32, 32, 4),
    ("fused", 4, 2, 32, 64, 7),
    ("fused", 4, 2, 64, 96, 7),
    ("mb", 4, 2, 96, 192, 10),
    ("mb", 6, 1, 192, 224, 19),
    ("mb", 6, 2, 224, 384, 25),
    ("mb", 6, 1, 384, 640, 7),
]
LAST_CHANNEL = 1280
BN_EPS = 1e-3


# ----------------------------------------------------------------------------
# Small helpers
def _round_up(x, m):
    return (x + m - 1) // m * m


def _pick_tile(d, cap=1024):
    """Tile size for a lane-major dim: full if small / not 128-aligned, else a
    power-of-two-ish multiple of 128 that divides it."""
    if d <= cap or d % 128 != 0:
        return d
    for t in (512, 256, 128):
        if d % t == 0:
            return t
    return d


def _row_tile(h, wcols, cout):
    """Pick an output row-tile height that divides h and keeps the f32
    accumulator around <=64K elements."""
    limit = max(1, (1 << 16) // max(1, wcols * cout))
    th = h
    while th > limit and th % 2 == 0:
        th //= 2
    return th


def _sigmoid(x):
    # divide on the EUP via approx reciprocal (exp is already EUP)
    return pl.reciprocal(1.0 + jnp.exp(-x), approx=True)


# ----------------------------------------------------------------------------
# Pallas kernels
def _mm_kernel(*refs, act, use_res):
    """Tiled matmul: bf16 x bf16 -> f32 acc, fused folded-BN (+SiLU, +residual)."""
    if use_res:
        x_ref, w_ref, s_ref, b_ref, r_ref, o_ref, acc_ref = refs
    else:
        x_ref, w_ref, s_ref, b_ref, o_ref, acc_ref = refs

    @pl.when(pl.program_id(2) == 0)
    def _():
        acc_ref[...] = jnp.zeros_like(acc_ref)

    acc_ref[...] += jnp.dot(x_ref[...], w_ref[...],
                            preferred_element_type=jnp.float32)

    @pl.when(pl.program_id(2) == pl.num_programs(2) - 1)
    def _():
        y = acc_ref[...] * s_ref[...] + b_ref[...]
        if act == "silu":
            y = y * _sigmoid(y)
        if use_res:
            y = y + r_ref[...].astype(jnp.float32)
        o_ref[...] = y.astype(o_ref.dtype)


def _conv3_kernel(x_ref, w_ref, s_ref, b_ref, o_ref, *, th, wp, act, use_res):
    """Stride-1 3x3 conv as 9 accumulated matmuls over shifted flat slabs of the
    padded, row-flattened image kept resident in VMEM. Fused BN (+SiLU).
    The center slab is exactly the un-shifted input, so it is reused as the
    residual when use_res (only valid when Cin == Cout)."""
    i = pl.program_id(1)
    m = th * wp
    base = i * m
    cout = w_ref.shape[2]
    acc = jnp.zeros((m, cout), jnp.float32)
    center = None
    for dy in range(3):
        for dx in range(3):
            slab = x_ref[0, pl.ds(base + dy * wp + dx, m), :]
            if use_res and dy == 1 and dx == 1:
                center = slab
            acc = acc + jnp.dot(slab, w_ref[dy * 3 + dx],
                                preferred_element_type=jnp.float32)
    y = acc * s_ref[...] + b_ref[...]
    if act == "silu":
        y = y * _sigmoid(y)
    if use_res:
        y = y + center.astype(jnp.float32)
    o_ref[...] = y.astype(o_ref.dtype)[None]


def _dw_kernel(x_ref, w_ref, s_ref, b_ref, o_ref, sum_ref, *, th):
    """Stride-1 depthwise 3x3: nine in-kernel taps from the resident padded
    slab, fused BN + SiLU, plus per-sample channel-sum epilogue for SE."""
    i = pl.program_id(1)
    _, hp, wp, ce = x_ref.shape
    wo = wp - 2
    xt = x_ref[0, pl.ds(i * th, th + 2), :, :].astype(jnp.float32)  # (th+2, wp, ce)
    acc = jnp.zeros((th, wo, ce), jnp.float32)
    for dy in range(3):
        for dx in range(3):
            acc = acc + xt[dy:dy + th, dx:dx + wo, :] * w_ref[dy * 3 + dx]
    y = acc * s_ref[...] + b_ref[...]
    y = y * _sigmoid(y)
    o_ref[...] = y.astype(o_ref.dtype).reshape(1, th, wo, ce)

    @pl.when(i == 0)
    def _():
        sum_ref[...] = jnp.zeros_like(sum_ref)

    sum_ref[...] += jnp.sum(y, axis=(0, 1)).reshape(1, ce)


def _dw_s2_kernel(t_ref, w_ref, s_ref, b_ref, o_ref, sum_ref):
    """Stride-2 depthwise 3x3 (only 2 layers in the net): pre-sliced taps,
    fused BN + SiLU + per-sample channel sums for SE."""
    _, _, hw, ce = t_ref.shape
    acc = jnp.zeros((hw, ce), jnp.float32)
    for k in range(9):
        acc = acc + t_ref[0, k].astype(jnp.float32) * w_ref[k]
    y = acc * s_ref[...] + b_ref[...]
    y = y * _sigmoid(y)
    o_ref[...] = y.astype(o_ref.dtype).reshape(1, hw, ce)
    sum_ref[...] = jnp.sum(y, axis=0, keepdims=True)


def _se_kernel(sum_ref, w1_ref, b1_ref, w2_ref, b2_ref, g_ref, *, inv_hw):
    """SE gates from precomputed channel sums: sigmoid(fc2(silu(fc1(mean))))."""
    m = sum_ref[...] * inv_hw
    h = jnp.dot(m, w1_ref[...], preferred_element_type=jnp.float32) + b1_ref[...]
    h = h * _sigmoid(h)
    g = jnp.dot(h, w2_ref[...], preferred_element_type=jnp.float32) + b2_ref[...]
    g_ref[...] = _sigmoid(g)


def _proj_kernel(*refs, use_res):
    """Per-sample gated projection: (x * SE-gate) @ W_proj with a K-axis
    accumulator, fused folded-BN (+residual)."""
    if use_res:
        x_ref, g_ref, w_ref, s_ref, b_ref, r_ref, o_ref, acc_ref = refs
    else:
        x_ref, g_ref, w_ref, s_ref, b_ref, o_ref, acc_ref = refs
    k = pl.program_id(1)

    @pl.when(k == 0)
    def _():
        acc_ref[...] = jnp.zeros_like(acc_ref)

    xg = x_ref[0].astype(jnp.float32) * g_ref[0]
    acc_ref[...] += jnp.dot(xg.astype(jnp.bfloat16), w_ref[...],
                            preferred_element_type=jnp.float32)

    @pl.when(k == pl.num_programs(1) - 1)
    def _():
        y = acc_ref[...] * s_ref[...] + b_ref[...]
        if use_res:
            y = y + r_ref[0].astype(jnp.float32)
        o_ref[...] = y.astype(o_ref.dtype)[None]


def _gap_kernel(x_ref, o_ref):
    o_ref[...] = jnp.mean(x_ref[...].astype(jnp.float32), axis=1)


# ----------------------------------------------------------------------------
# Kernel wrappers
def matmul_bn_act(x2d, w, scale, bias, *, act, residual=None):
    """Tiled (M, N, K) matmul with fused BN / SiLU / residual epilogue."""
    M, K = x2d.shape
    N = w.shape[1]
    tm = _round_up(M, 8) if M <= 512 else 512
    Mp = _round_up(M, tm)
    tn = _pick_tile(N)
    tk = _pick_tile(K)

    x2d = x2d.astype(jnp.bfloat16)
    if Mp != M:
        x2d = jnp.pad(x2d, ((0, Mp - M), (0, 0)))
        if residual is not None:
            residual = jnp.pad(residual, ((0, Mp - M), (0, 0)))

    in_specs = [
        pl.BlockSpec((tm, tk), lambda i, j, k: (i, k)),
        pl.BlockSpec((tk, tn), lambda i, j, k: (k, j)),
        pl.BlockSpec((1, tn), lambda i, j, k: (0, j)),
        pl.BlockSpec((1, tn), lambda i, j, k: (0, j)),
    ]
    args = [x2d, w, scale, bias]
    if residual is not None:
        in_specs.append(pl.BlockSpec((tm, tn), lambda i, j, k: (i, j)))
        args.append(residual)

    out = pl.pallas_call(
        functools.partial(_mm_kernel, act=act, use_res=residual is not None),
        out_shape=jax.ShapeDtypeStruct((Mp, N), jnp.bfloat16),
        grid=(Mp // tm, N // tn, K // tk),
        in_specs=in_specs,
        out_specs=pl.BlockSpec((tm, tn), lambda i, j, k: (i, j)),
        scratch_shapes=[pltpu.VMEM((tm, tn), jnp.float32)],
        compiler_params=pltpu.CompilerParams(
            dimension_semantics=("parallel", "parallel", "arbitrary"),
            vmem_limit_bytes=_VMEM_LIMIT),
    )(*args)
    return out[:M] if Mp != M else out


def conv3x3_s1(x, w3, scale, bias, *, act="silu", use_res=False):
    """Stride-1 3x3 conv (+BN +SiLU [+residual]) without HBM im2col."""
    n, h, w, cin = x.shape
    cout = w3.shape[2]
    wp = w + 2
    # Pad one extra bottom row so the (discarded) wrap-around columns of the
    # flat-slab formulation never read past the buffer.
    xp = jnp.pad(x, ((0, 0), (1, 2), (1, 1), (0, 0)))
    xflat = xp.reshape(n, (h + 3) * wp, cin)
    th = _row_tile(h, wp, cout)

    out_flat = pl.pallas_call(
        functools.partial(_conv3_kernel, th=th, wp=wp, act=act, use_res=use_res),
        out_shape=jax.ShapeDtypeStruct((n, h * wp, cout), jnp.bfloat16),
        grid=(n, h // th),
        in_specs=[
            pl.BlockSpec(((1, (h + 3) * wp, cin)), lambda b, i: (b, 0, 0)),
            pl.BlockSpec((9, cin, cout), lambda b, i: (0, 0, 0)),
            pl.BlockSpec((1, cout), lambda b, i: (0, 0)),
            pl.BlockSpec((1, cout), lambda b, i: (0, 0)),
        ],
        out_specs=pl.BlockSpec((1, th * wp, cout), lambda b, i: (b, i, 0)),
        compiler_params=pltpu.CompilerParams(
            dimension_semantics=("parallel", "arbitrary"),
            vmem_limit_bytes=_VMEM_LIMIT),
    )(xflat, w3, scale, bias)
    # Strip the two pad columns (small slice vs. the removed 18x im2col traffic).
    return out_flat.reshape(n, h, wp, cout)[:, :, :w, :]


def im2col3x3(x, stride):
    """Fallback path (only the 3 stride-2 dense convs use this)."""
    n, h, w, c = x.shape
    xp = jnp.pad(x, ((0, 0), (1, 1), (1, 1), (0, 0)))
    ho = (h - 1) // stride + 1
    wo = (w - 1) // stride + 1
    slabs = [xp[:, dy:dy + stride * ho:stride, dx:dx + stride * wo:stride, :]
             for dy in range(3) for dx in range(3)]
    patches = jnp.concatenate(slabs, axis=-1).reshape(n * ho * wo, 9 * c)
    return patches, ho, wo


def depthwise_s1(x, w_dw, scale, bias):
    n, h, w, ce = x.shape
    xp = jnp.pad(x, ((0, 0), (1, 1), (1, 1), (0, 0)))
    th = _row_tile(h, w + 2, ce)
    out, sums = pl.pallas_call(
        functools.partial(_dw_kernel, th=th),
        out_shape=(jax.ShapeDtypeStruct((n, h, w, ce), jnp.bfloat16),
                   jax.ShapeDtypeStruct((n, ce), jnp.float32)),
        grid=(n, h // th),
        in_specs=[
            pl.BlockSpec((1, h + 2, w + 2, ce), lambda b, i: (b, 0, 0, 0)),
            pl.BlockSpec((9, 1, ce), lambda b, i: (0, 0, 0)),
            pl.BlockSpec((1, ce), lambda b, i: (0, 0)),
            pl.BlockSpec((1, ce), lambda b, i: (0, 0)),
        ],
        out_specs=(pl.BlockSpec((1, th, w, ce), lambda b, i: (b, i, 0, 0)),
                   pl.BlockSpec((1, ce), lambda b, i: (b, 0))),
        compiler_params=pltpu.CompilerParams(
            dimension_semantics=("parallel", "arbitrary"),
            vmem_limit_bytes=_VMEM_LIMIT),
    )(xp, w_dw, scale, bias)
    return out, sums


def depthwise_s2(x, w_dw, scale, bias):
    n, h, w, ce = x.shape
    xp = jnp.pad(x, ((0, 0), (1, 1), (1, 1), (0, 0)))
    ho = (h - 1) // 2 + 1
    wo = (w - 1) // 2 + 1
    slabs = [xp[:, dy:dy + 2 * ho:2, dx:dx + 2 * wo:2, :]
             for dy in range(3) for dx in range(3)]
    taps = jnp.stack([s.reshape(n, ho * wo, ce) for s in slabs], axis=1)
    out, sums = pl.pallas_call(
        _dw_s2_kernel,
        out_shape=(jax.ShapeDtypeStruct((n, ho * wo, ce), jnp.bfloat16),
                   jax.ShapeDtypeStruct((n, ce), jnp.float32)),
        grid=(n,),
        in_specs=[
            pl.BlockSpec((1, 9, ho * wo, ce), lambda b: (b, 0, 0, 0)),
            pl.BlockSpec((9, 1, ce), lambda b: (0, 0, 0)),
            pl.BlockSpec((1, ce), lambda b: (0, 0)),
            pl.BlockSpec((1, ce), lambda b: (0, 0)),
        ],
        out_specs=(pl.BlockSpec((1, ho * wo, ce), lambda b: (b, 0, 0)),
                   pl.BlockSpec((1, ce), lambda b: (b, 0))),
        compiler_params=pltpu.CompilerParams(
            dimension_semantics=("parallel",),
            vmem_limit_bytes=_VMEM_LIMIT),
    )(taps, w_dw, scale, bias)
    return out, sums, ho, wo


def se_gates(sums, w1, b1, w2, b2, *, inv_hw):
    n, ce = sums.shape
    csq = w1.shape[1]
    return pl.pallas_call(
        functools.partial(_se_kernel, inv_hw=inv_hw),
        out_shape=jax.ShapeDtypeStruct((n, ce), jnp.float32),
        grid=(1,),
        in_specs=[
            pl.BlockSpec((n, ce), lambda i: (0, 0)),
            pl.BlockSpec((ce, csq), lambda i: (0, 0)),
            pl.BlockSpec((1, csq), lambda i: (0, 0)),
            pl.BlockSpec((csq, ce), lambda i: (0, 0)),
            pl.BlockSpec((1, ce), lambda i: (0, 0)),
        ],
        out_specs=pl.BlockSpec((n, ce), lambda i: (0, 0)),
        compiler_params=pltpu.CompilerParams(vmem_limit_bytes=_VMEM_LIMIT),
    )(sums, w1, b1, w2, b2)


def project_se(x3, gates, w, scale, bias, residual=None):
    n, hw, ce = x3.shape
    cout = w.shape[1]
    tk = _pick_tile(ce)
    g3 = gates.reshape(n, 1, ce)
    in_specs = [
        pl.BlockSpec((1, hw, tk), lambda b, k: (b, 0, k)),
        pl.BlockSpec((1, 1, tk), lambda b, k: (b, 0, k)),
        pl.BlockSpec((tk, cout), lambda b, k: (k, 0)),
        pl.BlockSpec((1, cout), lambda b, k: (0, 0)),
        pl.BlockSpec((1, cout), lambda b, k: (0, 0)),
    ]
    args = [x3, g3, w, scale, bias]
    if residual is not None:
        in_specs.append(pl.BlockSpec((1, hw, cout), lambda b, k: (b, 0, 0)))
        args.append(residual)
    return pl.pallas_call(
        functools.partial(_proj_kernel, use_res=residual is not None),
        out_shape=jax.ShapeDtypeStruct((n, hw, cout), jnp.bfloat16),
        grid=(n, ce // tk),
        in_specs=in_specs,
        out_specs=pl.BlockSpec((1, hw, cout), lambda b, k: (b, 0, 0)),
        scratch_shapes=[pltpu.VMEM((hw, cout), jnp.float32)],
        compiler_params=pltpu.CompilerParams(
            dimension_semantics=("parallel", "arbitrary"),
            vmem_limit_bytes=_VMEM_LIMIT),
    )(*args)


# ----------------------------------------------------------------------------
# Block-level jitted applies (repeated blocks of identical shape share compiles)
@functools.partial(jax.jit, static_argnames=("stride", "use_res"))
def fused_mbconv_simple(x, p, *, stride, use_res):
    n, h, w, cin = x.shape
    cout = p["w3"].shape[2]
    if stride == 1:
        return conv3x3_s1(x, p["w3"], p["s"], p["b"], act="silu", use_res=use_res)
    patches, ho, wo = im2col3x3(x, stride)
    res2d = x.reshape(n * h * w, cin) if use_res else None
    y = matmul_bn_act(patches, p["w3"].reshape(9 * cin, cout), p["s"], p["b"],
                      act="silu", residual=res2d)
    return y.reshape(n, ho, wo, cout)


@functools.partial(jax.jit, static_argnames=("stride", "use_res"))
def fused_mbconv(x, p, *, stride, use_res):
    n, h, w, cin = x.shape
    ce = p["w3"].shape[2]
    cout = p["w_proj"].shape[1]
    if stride == 1:
        hmid = conv3x3_s1(x, p["w3"], p["s_exp"], p["b_exp"], act="silu")
        ho, wo = h, w
    else:
        patches, ho, wo = im2col3x3(x, stride)
        hmid = matmul_bn_act(patches, p["w3"].reshape(9 * cin, ce),
                             p["s_exp"], p["b_exp"], act="silu"
                             ).reshape(n, ho, wo, ce)
    res2d = x.reshape(n * h * w, cin) if use_res else None
    y = matmul_bn_act(hmid.reshape(n * ho * wo, ce), p["w_proj"],
                      p["s_proj"], p["b_proj"], act="none", residual=res2d)
    return y.reshape(n, ho, wo, cout)


@functools.partial(jax.jit, static_argnames=("stride", "use_res"))
def mbconv(x, p, *, stride, use_res):
    n, h, w, cin = x.shape
    ce = p["w_exp"].shape[1]
    cout = p["w_proj"].shape[1]
    hmid = matmul_bn_act(x.reshape(n * h * w, cin), p["w_exp"],
                         p["s_exp"], p["b_exp"], act="silu").reshape(n, h, w, ce)
    if stride == 1:
        h4, sums = depthwise_s1(hmid, p["w_dw"], p["s_dw"], p["b_dw"])
        ho, wo = h, w
        h3 = h4.reshape(n, ho * wo, ce)
    else:
        h3, sums, ho, wo = depthwise_s2(hmid, p["w_dw"], p["s_dw"], p["b_dw"])
    gates = se_gates(sums, p["w_se1"], p["b_se1"], p["w_se2"], p["b_se2"],
                     inv_hw=1.0 / float(ho * wo))
    res = x.reshape(n, h * w, cin) if use_res else None
    y = project_se(h3, gates, p["w_proj"], p["s_proj"], p["b_proj"], residual=res)
    return y.reshape(n, ho, wo, cout)


@jax.jit
def stem_apply(x, p):
    n, h, w, c = x.shape
    cout = p["w3"].shape[2]
    patches, ho, wo = im2col3x3(x, 2)
    y = matmul_bn_act(patches, p["w3"].reshape(9 * c, cout), p["s"], p["b"],
                      act="silu")
    return y.reshape(n, ho, wo, cout)


@jax.jit
def head_apply(x, p):
    n, h, w, c = x.shape
    y = matmul_bn_act(x.reshape(n * h * w, c), p["w"], p["s"], p["b"], act="silu")
    return y.reshape(n, h, w, -1)


@jax.jit
def gap_apply(x):
    n, h, w, c = x.shape
    x3 = x.reshape(n, h * w, c)
    return pl.pallas_call(
        _gap_kernel,
        out_shape=jax.ShapeDtypeStruct((n, c), jnp.float32),
        grid=(1,),
        in_specs=[pl.BlockSpec((n, h * w, c), lambda i: (0, 0, 0))],
        out_specs=pl.BlockSpec((n, c), lambda i: (0, 0)),
        compiler_params=pltpu.CompilerParams(vmem_limit_bytes=_VMEM_LIMIT),
    )(x3)


# ----------------------------------------------------------------------------
# Deterministic synthetic parameters (shapes match efficientnet_v2_l, eval mode)
class KeyGen:
    def __init__(self, key):
        self._key = key

    def __call__(self):
        self._key, k = jax.random.split(self._key)
        return k


def _conv_w(kg, kh, kw, cin, cout):
    fan_in = kh * kw * cin
    w = jax.random.normal(kg(), (kh, kw, cin, cout), dtype=jnp.float32)
    return w * (1.0 / fan_in) ** 0.5


def _fc_w(kg, cin, cout):
    w = jax.random.normal(kg(), (cin, cout), dtype=jnp.float32)
    return w * (1.0 / cin) ** 0.5


def _bn_fold(kg, c):
    gamma = 1.0 + 0.1 * jax.random.normal(kg(), (c,), dtype=jnp.float32)
    beta = 0.1 * jax.random.normal(kg(), (c,), dtype=jnp.float32)
    rmean = 0.1 * jax.random.normal(kg(), (c,), dtype=jnp.float32)
    rvar = 1.0 + 0.1 * jnp.abs(jax.random.normal(kg(), (c,), dtype=jnp.float32))
    scale = gamma / jnp.sqrt(rvar + BN_EPS)
    bias = beta - rmean * scale
    return scale.reshape(1, c), bias.reshape(1, c)


def init_params(key):
    kg = KeyGen(key)
    params = {}

    def conv3(cin, cout):
        return _conv_w(kg, 3, 3, cin, cout).reshape(9, cin, cout).astype(jnp.bfloat16)

    def conv1(cin, cout):
        return _conv_w(kg, 1, 1, cin, cout).reshape(cin, cout).astype(jnp.bfloat16)

    s, b = _bn_fold(kg, 32)
    params["stem"] = {"w3": conv3(3, 32), "s": s, "b": b}

    stages = []
    for btype, ratio, stride, cin, cout, nlayers in STAGES:
        blocks = []
        for i in range(nlayers):
            in_ch = cin if i == 0 else cout
            ce = in_ch * ratio
            if btype == "fused":
                if ratio == 1:
                    s, b = _bn_fold(kg, cout)
                    bp = {"w3": conv3(in_ch, cout), "s": s, "b": b}
                else:
                    se_, be_ = _bn_fold(kg, ce)
                    sp_, bp_ = _bn_fold(kg, cout)
                    bp = {"w3": conv3(in_ch, ce), "s_exp": se_, "b_exp": be_,
                          "w_proj": conv1(ce, cout), "s_proj": sp_, "b_proj": bp_}
            else:
                csq = max(1, in_ch // 4)
                se_, be_ = _bn_fold(kg, ce)
                sd_, bd_ = _bn_fold(kg, ce)
                sp_, bp_ = _bn_fold(kg, cout)
                w_dw = (jax.random.normal(kg(), (9, 1, ce), dtype=jnp.float32)
                        * (1.0 / 9.0) ** 0.5)
                bp = {"w_exp": conv1(in_ch, ce), "s_exp": se_, "b_exp": be_,
                      "w_dw": w_dw, "s_dw": sd_, "b_dw": bd_,
                      "w_se1": _fc_w(kg, ce, csq),
                      "b_se1": 0.1 * jax.random.normal(kg(), (1, csq),
                                                       dtype=jnp.float32),
                      "w_se2": _fc_w(kg, csq, ce),
                      "b_se2": 0.1 * jax.random.normal(kg(), (1, ce),
                                                       dtype=jnp.float32),
                      "w_proj": conv1(ce, cout), "s_proj": sp_, "b_proj": bp_}
            blocks.append(bp)
        stages.append(blocks)
    params["stages"] = stages

    s, b = _bn_fold(kg, LAST_CHANNEL)
    params["head"] = {"w": conv1(640, LAST_CHANNEL), "s": s, "b": b}
    return params


# ----------------------------------------------------------------------------
# Full forward pass: features -> avgpool, output (N, 1280, 1, 1)
def efficientnet_encoder(x_nchw, params):
    x = jnp.transpose(x_nchw, (0, 2, 3, 1)).astype(jnp.bfloat16)  # NCHW -> NHWC
    x = stem_apply(x, params["stem"])
    for (btype, ratio, stride, cin, cout, _n), sp in zip(STAGES, params["stages"]):
        for i, bp in enumerate(sp):
            s = stride if i == 0 else 1
            in_ch = cin if i == 0 else cout
            use_res = (s == 1 and in_ch == cout)
            if btype == "fused":
                if ratio == 1:
                    x = fused_mbconv_simple(x, bp, stride=s, use_res=use_res)
                else:
                    x = fused_mbconv(x, bp, stride=s, use_res=use_res)
            else:
                x = mbconv(x, bp, stride=s, use_res=use_res)
    x = head_apply(x, params["head"])
    pooled = gap_apply(x)                                        # (N, 1280) f32
    return pooled.reshape(pooled.shape[0], pooled.shape[1], 1, 1)


if __name__ == "__main__":
    root = jax.random.PRNGKey(0)
    pkey, xkey = jax.random.split(root)
    params = init_params(pkey)
    # PyTorch-style NCHW input (small spatial size; network strides 64 -> 2 -> pool 1)
    x = jax.random.normal(xkey, (2, 3, 64, 64), dtype=jnp.float32)
    out = efficientnet_encoder(x, params)
    out = jax.block_until_ready(out)
    assert out.shape == (2, 1280, 1, 1), out.shape
    assert out.dtype == jnp.float32
    assert bool(jnp.all(jnp.isfinite(out)))
    print("KERNEL_OK")
</pallas_src>

<mosaic_0001>
module attributes {stable_mosaic.version = 11 : i64} {
  func.func @_mm_kernel(%arg0: i32, %arg1: i32, %arg2: i32, %arg3: memref<512x27xbf16, #tpu.memory_space<vmem>>, %arg4: memref<27x32xbf16, #tpu.memory_space<vmem>>, %arg5: memref<1x32xf32, #tpu.memory_space<vmem>>, %arg6: memref<1x32xf32, #tpu.memory_space<vmem>>, %arg7: memref<512x32xbf16, #tpu.memory_space<vmem>>, %arg8: memref<512x32xf32, #tpu.memory_space<vmem>>) attributes {dimension_semantics = [#tpu.dimension_semantics<parallel>, #tpu.dimension_semantics<parallel>, #tpu.dimension_semantics<arbitrary>], iteration_bounds = array<i64: 4, 1, 1>, scalar_prefetch = 0 : i64, scratch_operands = 1 : i64, tpu.core_type = #tpu.core_type<tc>, window_params = [{transform_indices = @transform_0, window_bounds = array<i64: 512, 27>}, {transform_indices = @transform_1, window_bounds = array<i64: 27, 32>}, {transform_indices = @transform_2, window_bounds = array<i64: 1, 32>}, {transform_indices = @transform_3, window_bounds = array<i64: 1, 32>}, {transform_indices = @transform_4, window_bounds = array<i64: 512, 32>}]} {
    %c0_i32 = arith.constant 0 : i32
    %0 = arith.cmpi eq, %arg2, %c0_i32 : i32
    %1 = arith.extui %0 : i1 to i32
    %c0_i32_0 = arith.constant 0 : i32
    %2 = arith.cmpi ne, %1, %c0_i32_0 : i32
    scf.if %2 {
      %cst_10 = arith.constant 0.000000e+00 : f32
      %12 = vector.broadcast %cst_10 : f32 to vector<512x32xf32>
      %c0_11 = arith.constant 0 : index
      %c0_12 = arith.constant 0 : index
      %13 = vector.load %arg8[%c0_11, %c0_12] : memref<512x32xf32, #tpu.memory_space<vmem>>, vector<512x32xf32>
      tpu.vector_store %arg8[%c0_11, %c0_12], %12 {strides = array<i32>} : memref<512x32xf32, #tpu.memory_space<vmem>>, vector<512x32xf32>,
    } else {
    }
    %c0 = arith.constant 0 : index
    %c0_1 = arith.constant 0 : index
    %3 = vector.load %arg8[%c0, %c0_1] : memref<512x32xf32, #tpu.memory_space<vmem>>, vector<512x32xf32>
    %c0_2 = arith.constant 0 : index
    %c0_3 = arith.constant 0 : index
    %4 = vector.load %arg3[%c0_2, %c0_3] : memref<512x27xbf16, #tpu.memory_space<vmem>>, vector<512x27xbf16>
    %c0_4 = arith.constant 0 : index
    %c0_5 = arith.constant 0 : index
    %5 = vector.load %arg4[%c0_4, %c0_5] : memref<27x32xbf16, #tpu.memory_space<vmem>>, vector<27x32xbf16>
    %cst = arith.constant dense<0.000000e+00> : vector<512x32xf32>
    %6 = tpu.matmul %4, %5, %cst {dimension_numbers = #tpu.dot_dimension_numbers<[1], [0], [0], [1], [0, 0, 1, 1], [], []>} : vector<512x27xbf16>, vector<27x32xbf16>, vector<512x32xf32> -> vector<512x32xf32>
    %7 = arith.addf %3, %6 : vector<512x32xf32>
    %c0_6 = arith.constant 0 : index
    %c0_7 = arith.constant 0 : index
    %8 = vector.load %arg8[%c0_6, %c0_7] : memref<512x32xf32, #tpu.memory_space<vmem>>, vector<512x32xf32>
    tpu.vector_store %arg8[%c0_6, %c0_7], %7 {strides = array<i32>} : memref<512x32xf32, #tpu.memory_space<vmem>>, vector<512x32xf32>,
    %c0_i32_8 = arith.constant 0 : i32
    %9 = arith.cmpi eq, %arg2, %c0_i32_8 : i32
    %10 = arith.extui %9 : i1 to i32
    %c0_i32_9 = arith.constant 0 : i32
    %11 = arith.cmpi ne, %10, %c0_i32_9 : i32
    scf.if %11 {
      %c0_10 = arith.constant 0 : index
      %c0_11 = arith.constant 0 : index
      %12 = vector.load %arg8[%c0_10, %c0_11] : memref<512x32xf32, #tpu.memory_space<vmem>>, vector<512x32xf32>
      %c0_12 = arith.constant 0 : index
      %c0_13 = arith.constant 0 : index
      %13 = vector.load %arg5[%c0_12, %c0_13] : memref<1x32xf32, #tpu.memory_space<vmem>>, vector<1x32xf32>
      %14 = vector.broadcast %13 : vector<1x32xf32> to vector<512x32xf32>
      %15 = arith.mulf %12, %14 : vector<512x32xf32>
      %c0_14 = arith.constant 0 : index
      %c0_15 = arith.constant 0 : index
      %16 = vector.load %arg6[%c0_14, %c0_15] : memref<1x32xf32, #tpu.memory_space<vmem>>, vector<1x32xf32>
      %17 = vector.broadcast %16 : vector<1x32xf32> to vector<512x32xf32>
      %18 = arith.addf %15, %17 : vector<512x32xf32>
      %cst_16 = arith.constant 0.000000e+00 : f32
      %19 = vector.broadcast %cst_16 : f32 to vector<512x32xf32>
      %20 = arith.subf %19, %18 : vector<512x32xf32>
      %21 = math.exp %20 : vector<512x32xf32>
      %cst_17 = arith.constant 1.000000e+00 : f32
      %22 = vector.broadcast %cst_17 : f32 to vector<512x32xf32>
      %23 = arith.addf %22, %21 : vector<512x32xf32>
      %24 = tpu.reciprocal %23 {approx = true} : vector<512x32xf32> -> vector<512x32xf32>
      %25 = arith.mulf %18, %24 : vector<512x32xf32>
      %26 = arith.truncf %25 : vector<512x32xf32> to vector<512x32xbf16>
      %c0_18 = arith.constant 0 : index
      %c0_19 = arith.constant 0 : index
      %27 = vector.load %arg7[%c0_18, %c0_19] : memref<512x32xbf16, #tpu.memory_space<vmem>>, vector<512x32xbf16>
      tpu.vector_store %arg7[%c0_18, %c0_19], %26 {strides = array<i32>} : memref<512x32xbf16, #tpu.memory_space<vmem>>, vector<512x32xbf16>,
    } else {
    }
    return
  }
  func.func @transform_0(%arg0: i32, %arg1: i32, %arg2: i32) -> (i32, i32) {
    %c0_i32 = arith.constant 0 : i32
    return %arg0, %arg2 : i32, i32
  }
  func.func @transform_1(%arg0: i32, %arg1: i32, %arg2: i32) -> (i32, i32) {
    %c0_i32 = arith.constant 0 : i32
    return %arg2, %arg1 : i32, i32
  }
  func.func @transform_2(%arg0: i32, %arg1: i32, %arg2: i32) -> (i32, i32) {
    %c0_i32 = arith.constant 0 : i32
    %c0_i32_0 = arith.constant 0 : i32
    return %c0_i32, %arg1 : i32, i32
  }
  func.func @transform_3(%arg0: i32, %arg1: i32, %arg2: i32) -> (i32, i32) {
    %c0_i32 = arith.constant 0 : i32
    %c0_i32_0 = arith.constant 0 : i32
    return %c0_i32, %arg1 : i32, i32
  }
  func.func @transform_4(%arg0: i32, %arg1: i32, %arg2: i32) -> (i32, i32) {
    %c0_i32 = arith.constant 0 : i32
    return %arg0, %arg1 : i32, i32
  }
}

</mosaic_0001>

<bundles_post_ra>
// kernel: stem_apply.1
= control target key start
LH: loop header
LB: loop body
LE: loop exit
PB: predicated region body
PF: predicated region fallthrough
CT: control target
= control target key end

     0   :  { %9 = vsyncpa [#allocation4], 0  ;;  %s3627_s0 = inlined_call_operand.vmem [shape: bf16[2048,27], index: 0, kind: input, shape index: {}]   ;;  %s3628_s1 = inlined_call_operand.vmem [shape: bf16[27,32], index: 1, kind: input, shape index: {}]   ;;  %s3629_s2 = inlined_call_operand.vmem [shape: f32[1,32], index: 2, kind: input, shape index: {}]   ;;  %s3630_s3 = inlined_call_operand.vmem [shape: f32[1,32], index: 3, kind: input, shape index: {}]   ;;  %s3631_s4 = inlined_call_operand.hbm [shape: bf16[2048,32], index: 4, kind: output, shape index: {}]  }
   0x1   :  { %11 = vsyncpa [#allocation4 + $0x1], 0  ;;  %s2575_s15 = smov 0   ;;  %s2577_s16 = smov 0  }
   0x2   :  { %s2579_s17 = smov 0   ;;  %s2581_s18 = smov 0  }
   0x3   :  { %s2583_s19 = smov 0   ;;  %s2585_s20 = smov 0  }
   0x4 LB: > { %s1920_s21 = sadd.s32 4294967295, %s2544_s20   ;;  %s1921_s22 = sadd.s32 4294967294, %s2544_s20   ;;  %s2544_s20 = sphi %s2585_s20, %s17_s20   ;;  %s2540_s19 = sphi %s2583_s19, %s3638_s19   ;;  %s2536_s18 = sphi %s2581_s18, %s3637_s18   ;;  %s2532_s17 = sphi %s2579_s17, %s3636_s17   ;;  %s2528_s16 = sphi %s2577_s16, %s3635_s16   ;;  %s2524_s15 = sphi %s2575_s15, %s3634_s15  }
   0x5   : > { %s36_s23 = sadd.s32 1, %s2540_s19  ;;  %s153_s24 = sadd.s32 1, %s2532_s17 }
   0x6   : > { %p38_p0 = scmp.ge.s32.totalorder %s36_s23, 4  ;;  %p163_p1 = scmp.ne.s32.totalorder %s2532_s17, %s2528_s16 }
   0x7   : > { %p164_p2 = scmp.eq.s32.totalorder %s1920_s21, 3  ;;  %p169_p3 = scmp.ne.s32.totalorder %s2528_s16, %s2524_s15 }
   0x8   : > { %s3640_s23 = smov (%p38_p0, %s36_s23), 0  ;;  %p170_p5 = scmp.eq.s32.totalorder %s1921_s22, 3 }
   0x9   : > { %p2615_p4 = por %p164_p2, %p163_p1  ;;  %s148_s26 = ssub.s32 %s2540_s19, %s3640_s23 }
   0xa   : > { %p1927_p6 = scmp.ge.s32.totalorder %s2544_s20, 1  ;;  %p151_p7 = scmp.eq.s32.totalorder %s148_s26, 0 }
   0xb   : > { %p2622_p8 = por %p170_p5, %p169_p3  ;;  %p224_p9 = scmp.lt.s32.totalorder %s2544_s20, 5 }
   0xc   : > { %s2628_s28 = scalar_select %p151_p7, %s2532_s17, %s153_s24  }
   0xd   : > { %p225_p10 = pnand %p1927_p6, %p224_p9 }
   0xe   : > { %s1929_s7 = sshll.u32 (!%p225_p10), %s2536_s18, 6  ;;  %s264_s26 = sand.u32 (!%p225_p10), 1, %s2528_s16  }
   0xf   : > { %228 = sbr.rel (%p225_p10) target bundleno = 372 (0x174), region = 36  ;;  %p268_p11 = scmp.lt.s32.totalorder (!%p225_p10), %s1929_s7, 255 }
  0x10   : > { %s2873_s29 = sshll.u32 (!%p225_p10), %s264_s26, 8  ;;  %s2486_s9 = scalar_lea.hbm (!%p225_p10), %s3631_s4, 1024 }
  0x11   : > { %s2910_s30 = scalar_lea.vmem (!%p225_p10), [#allocation3], %s2873_s29 }
  0x12   : > { %s1797_s24 = sshll.u32 (!%p225_p10), %s2910_s30, 4  ;;  %s1798_s24 = int_to_ptr.vmem [resolvable:$true] %s1797_s24 }
  0x14   : > { %v2065_v0 = vld [vmem:[%s3628_s1 + $0x8] sm:$0xf]  ;;  %v2137_v1 = vld [vmem:[%s3628_s1 + $0x8] sm:$0x30]  ;;  %vm762_vm0 = vcmask 1044480   ;;  %vm763_vm1 = vcmask 1045504  }
  0x15   : > { %v2066_v2 = vor.u32 %v2137_v1, %v2065_v0  ;;  %v2546_v3 = vmov 65535   ;;  %s3642_s7 = smov (!%p268_p11, %s1929_s7), 255  ;;  %v2136_v7 = vld [vmem:[%s3628_s1] sm:$0xff]  ;;  %vm665_vm2 = vcmask 220160   ;;  %vm297_vm3 = vcmask 261120  }
  0x16   : > { %v764_v4 = vsel %vm762_vm0, 4294967295, %v2546_v3  ;;  %s1930_s10 = sshll.u32 %s3642_s7, 2  ;;  %v2547_v32 = vmov 0.0   ;;  %v2811_v45 = vld [vmem:[%s3629_s2] ss:$0 sm:$0xff]  ;;  %vm1718_vm4 = vcmask 257024  }
  0x17   : > { %v765_v5 = vsel %vm763_vm1, %v764_v4, 0  ;;  %s2643_s13 = scalar_lea.vmem %s3627_s0, %s1930_s10  ;;  %298 = vst.msk [vmem:[#allocation2] sm:$0xff] %vm297_vm3, %v2547_v32  ;;  %v2820_v50 = vld [vmem:[%s3630_s3] ss:$0 sm:$0xff] }
  0x18   : > { %v767_v6 = vand.u32 %v2066_v2, %v765_v5  ;;  %v2104_v8 = vld [vmem:[%s2643_s13] sm:$0xff]  ;;  %v2105_v12 = vld [vmem:[%s2643_s13 + $0x8] sm:$0xff]  ;;  %v2106_v16 = vld [vmem:[%s2643_s13 + $0x10] sm:$0xff]  ;;  %299 = vst.msk [vmem:[#allocation2 + $0x8] sm:$0xff] %vm297_vm3, %v2547_v32 }
  0x19   : > { %v2112_v9 = vld [vmem:[%s2643_s13 + $0x40] sm:$0xff]  ;;  %v2113_v13 = vld [vmem:[%s2643_s13 + $0x48] sm:$0xff]  ;;  %v2114_v17 = vld [vmem:[%s2643_s13 + $0x50] sm:$0xff]  ;;  %300 = vst.msk [vmem:[#allocation2 + $0x10] sm:$0xff] %vm297_vm3, %v2547_v32 }
  0x1a   : > { %775 = vmatpush.bf16.msra.mxu0 %v767_v6  ;;  %2139 = vmatpush.bf16.msra.mxu1 %v767_v6  ;;  %v2120_v10 = vld [vmem:[%s2643_s13 + $0x80] sm:$0xff]  ;;  %v2121_v14 = vld [vmem:[%s2643_s13 + $0x88] sm:$0xff]  ;;  %v2122_v18 = vld [vmem:[%s2643_s13 + $0x90] sm:$0xff]  ;;  %301 = vst.msk [vmem:[#allocation2 + $0x18] sm:$0xff] %vm297_vm3, %v2547_v32 }
  0x1b   : > { %2140 = vmatpush.bf16.msra.mxu2 %v767_v6  ;;  %2141 = vmatpush.bf16.msra.mxu3 %v767_v6  ;;  %v2128_v11 = vld [vmem:[%s2643_s13 + $0xc0] sm:$0xff]  ;;  %v2129_v15 = vld [vmem:[%s2643_s13 + $0xc8] sm:$0xff]  ;;  %v2130_v19 = vld [vmem:[%s2643_s13 + $0xd0] sm:$0xff]  ;;  %302 = vst.msk [vmem:[#allocation2 + $0x20] sm:$0xff] %vm297_vm3, %v2547_v32 }
  0x1c   : > { %v2107_v20 = vld [vmem:[%s2643_s13 + $0x18] sm:$0xff]  ;;  %v2108_v24 = vld [vmem:[%s2643_s13 + $0x20] sm:$0xff]  ;;  %v2109_v28 = vld [vmem:[%s2643_s13 + $0x28] sm:$0xff]  ;;  %303 = vst.msk [vmem:[#allocation2 + $0x28] sm:$0xff] %vm297_vm3, %v2547_v32 }
  0x1d   : > { %v2115_v21 = vld [vmem:[%s2643_s13 + $0x58] sm:$0xff]  ;;  %v2116_v25 = vld [vmem:[%s2643_s13 + $0x60] sm:$0xff]  ;;  %v2117_v29 = vld [vmem:[%s2643_s13 + $0x68] sm:$0xff]  ;;  %304 = vst.msk [vmem:[#allocation2 + $0x30] sm:$0xff] %vm297_vm3, %v2547_v32 }
  0x1e   : > { %776 = vmatpush.bf16.msra.mxu0 %v2136_v7  ;;  %2142 = vmatpush.bf16.msra.mxu1 %v2136_v7  ;;  %v2123_v22 = vld [vmem:[%s2643_s13 + $0x98] sm:$0xff]  ;;  %v2124_v26 = vld [vmem:[%s2643_s13 + $0xa0] sm:$0xff]  ;;  %v2125_v30 = vld [vmem:[%s2643_s13 + $0xa8] sm:$0xff]  ;;  %305 = vst.msk [vmem:[#allocation2 + $0x38] sm:$0xff] %vm297_vm3, %v2547_v32 }
  0x1f   : > { %2143 = vmatpush.bf16.msra.mxu2 %v2136_v7  ;;  %2144 = vmatpush.bf16.msra.mxu3 %v2136_v7  ;;  %v2131_v23 = vld [vmem:[%s2643_s13 + $0xd8] sm:$0xff]  ;;  %v2132_v27 = vld [vmem:[%s2643_s13 + $0xe0] sm:$0xff]  ;;  %v2133_v31 = vld [vmem:[%s2643_s13 + $0xe8] sm:$0xff]  ;;  %306 = vst.msk [vmem:[#allocation2 + $0x40] sm:$0xff] %vm297_vm3, %v2547_v32 }
  0x20   : > { %307 = vst.msk [vmem:[#allocation2 + $0x48] sm:$0xff] %vm297_vm3, %v2547_v32  ;;  %v2110_v33 = vld [vmem:[%s2643_s13 + $0x30] sm:$0xff]  ;;  %v2111_v37 = vld [vmem:[%s2643_s13 + $0x38] sm:$0xff]  ;;  %v362_v41 = vld [vmem:[#allocation2] sm:$0xff] }
  0x21   : > { %2067 = vmatmul.msk.bf16.vlgmr.msra.gmra.mxu0 %vm665_vm2, %v2104_v8  ;;  %2075 = vmatmul.msk.bf16.vlgmr.msra.gmra.mxu1 %vm665_vm2, %v2112_v9  ;;  %v2118_v34 = vld [vmem:[%s2643_s13 + $0x70] sm:$0xff]  ;;  %308 = vst.msk [vmem:[#allocation2 + $0x50] sm:$0xff] %vm297_vm3, %v2547_v32  ;;  %v2119_v38 = vld [vmem:[%s2643_s13 + $0x78] sm:$0xff]  ;;  %v363_v0 = vld [vmem:[#allocation2 + $0x8] sm:$0xff] }
  0x22   : > { %2083 = vmatmul.msk.bf16.vlgmr.msra.gmra.mxu2 %vm665_vm2, %v2120_v10  ;;  %2091 = vmatmul.msk.bf16.vlgmr.msra.gmra.mxu3 %vm665_vm2, %v2128_v11  ;;  %v2126_v35 = vld [vmem:[%s2643_s13 + $0xb0] sm:$0xff]  ;;  %309 = vst.msk [vmem:[#allocation2 + $0x58] sm:$0xff] %vm297_vm3, %v2547_v32  ;;  %v2127_v39 = vld [vmem:[%s2643_s13 + $0xb8] sm:$0xff] }
  0x23   : > { %v2134_v36 = vld [vmem:[%s2643_s13 + $0xf0] sm:$0xff]  ;;  %310 = vst.msk [vmem:[#allocation2 + $0x60] sm:$0xff] %vm297_vm3, %v2547_v32  ;;  %v2135_v40 = vld [vmem:[%s2643_s13 + $0xf8] sm:$0xff]  ;;  %s2138_s13 = sshll.u32 %s2536_s18, 8  ;;  %s1784_s18 = scalar_lea.sflag [#allocation4], %s264_s26 }
  0x24   : > { %311 = vst.msk [vmem:[#allocation2 + $0x68] sm:$0xff] %vm297_vm3, %v2547_v32  ;;  %v364_v8 = vld [vmem:[#allocation2 + $0x10] sm:$0xff]  ;;  %s1796_s22 = scalar_lea.hbm %s3631_s4, %s2138_s13 }
  0x25   : > { %312 = vst.msk [vmem:[#allocation2 + $0x70] sm:$0xff] %vm297_vm3, %v2547_v32  ;;  %s1799_s29 = sshll.u32 %s1796_s22, 4  ;;  %s1800_s29 = int_to_ptr.hbm [resolvable:$true] %s1799_s29 }
  0x26   : > { %313 = vst.msk [vmem:[#allocation2 + $0x78] sm:$0xff] %vm297_vm3, %v2547_v32  ;;  %s2480_s5 = sshra.s32 %s1800_s29, 4  ;;  %s2481_s5 = int_to_ptr.hbm [resolvable:$true] %s2480_s5 }
  0x27   : > { %314 = vst.msk [vmem:[#allocation2 + $0x80] sm:$0xff] %vm297_vm3, %v2547_v32  ;;  %s2482_s6 = scalar_lea.hbm %s2481_s5, 256  ;;  %p2487_p1 = scmp.lt.s32.totalorder %s2481_s5, %s3631_s4 }
  0x28   : > { %315 = vst.msk [vmem:[#allocation2 + $0x88] sm:$0xff] %vm297_vm3, %v2547_v32  ;;  %p2483_p12 = scmp.ne.s32.totalorder %s2481_s5, %s2482_s6  ;;  %p2488_p2 = scmp.lt.s32.totalorder %s2486_s9, %s2482_s6 }
  0x29   : > { %316 = vst.msk [vmem:[#allocation2 + $0x90] sm:$0xff] %vm297_vm3, %v2547_v32 }
  0x2a   : > { %317 = vst.msk [vmem:[#allocation2 + $0x98] sm:$0xff] %vm297_vm3, %v2547_v32  ;;  %p2484_p13 = pnand %p2483_p12, %p2615_p4  ;;  %p2489_p3 = por %p2488_p2, %p2487_p1 }
  0x2b   : > { %318 = vst.msk [vmem:[#allocation2 + $0xa0] sm:$0xff] %vm297_vm3, %v2547_v32 }
  0x2c   : > { %319 = vst.msk [vmem:[#allocation2 + $0xa8] sm:$0xff] %vm297_vm3, %v2547_v32  ;;  %p2485_p0 = pneg %p2484_p13 }
  0x2d   : > { %320 = vst.msk [vmem:[#allocation2 + $0xb0] sm:$0xff] %vm297_vm3, %v2547_v32 }
  0x2e   : > { %321 = vst.msk [vmem:[#allocation2 + $0xb8] sm:$0xff] %vm297_vm3, %v2547_v32  ;;  %v378_v55 = vld [vmem:[#allocation2 + $0x80] sm:$0xff]  ;;  %p2490_p5 = pnand %p2489_p3, %p2485_p0 }
  0x2f   : > { %322 = vst.msk [vmem:[#allocation2 + $0xc0] sm:$0xff] %vm297_vm3, %v2547_v32  ;;  %v379_v2 = vld [vmem:[#allocation2 + $0x88] sm:$0xff] }
  0x30   : > { %323 = vst.msk [vmem:[#allocation2 + $0xc8] sm:$0xff] %vm297_vm3, %v2547_v32  ;;  %v380_v10 = vld [vmem:[#allocation2 + $0x90] sm:$0xff] }
  0x31   : > { %2068 = vmatmul.msk.bf16.gmra.mxu0 %vm665_vm2, %v2105_v12  ;;  %2076 = vmatmul.msk.bf16.gmra.mxu1 %vm665_vm2, %v2113_v13  ;;  %324 = vst.msk [vmem:[#allocation2 + $0xd0] sm:$0xff] %vm297_vm3, %v2547_v32 }
  0x32   : > { %2084 = vmatmul.msk.bf16.gmra.mxu2 %vm665_vm2, %v2121_v14  ;;  %2092 = vmatmul.msk.bf16.gmra.mxu3 %vm665_vm2, %v2129_v15  ;;  %325 = vst.msk [vmem:[#allocation2 + $0xd8] sm:$0xff] %vm297_vm3, %v2547_v32 }
  0x33   : > { %326 = vst.msk [vmem:[#allocation2 + $0xe0] sm:$0xff] %vm297_vm3, %v2547_v32 }
  0x34   : > { %327 = vst.msk [vmem:[#allocation2 + $0xe8] sm:$0xff] %vm297_vm3, %v2547_v32 }
  0x35   : > { %328 = vst.msk [vmem:[#allocation2 + $0xf0] sm:$0xff] %vm297_vm3, %v2547_v32 }
  0x36   : > { %329 = vst.msk [vmem:[#allocation2 + $0xf8] sm:$0xff] %vm297_vm3, %v2547_v32 }
  0x37   : > { %330 = vst.msk [vmem:[#allocation2 + $0x100] sm:$0xff] %vm297_vm3, %v2547_v32 }
  0x38   : > { %331 = vst.msk [vmem:[#allocation2 + $0x108] sm:$0xff] %vm297_vm3, %v2547_v32 }
  0x39   : > { %332 = vst.msk [vmem:[#allocation2 + $0x110] sm:$0xff] %vm297_vm3, %v2547_v32 }
  0x3a   : > { %333 = vst.msk [vmem:[#allocation2 + $0x118] sm:$0xff] %vm297_vm3, %v2547_v32 }
  0x3b   : > { %334 = vst.msk [vmem:[#allocation2 + $0x120] sm:$0xff] %vm297_vm3, %v2547_v32 }
  0x3c   : > { %335 = vst.msk [vmem:[#allocation2 + $0x128] sm:$0xff] %vm297_vm3, %v2547_v32 }
  0x3d   : > { %336 = vst.msk [vmem:[#allocation2 + $0x130] sm:$0xff] %vm297_vm3, %v2547_v32 }
  0x3e   : > { %337 = vst.msk [vmem:[#allocation2 + $0x138] sm:$0xff] %vm297_vm3, %v2547_v32  ;;  %v394_v58 = vld [vmem:[#allocation2 + $0x100] sm:$0xff] }
  0x3f   : > { %338 = vst.msk [vmem:[#allocation2 + $0x140] sm:$0xff] %vm297_vm3, %v2547_v32  ;;  %v395_v4 = vld [vmem:[#allocation2 + $0x108] sm:$0xff] }
  0x40   : > { %339 = vst.msk [vmem:[#allocation2 + $0x148] sm:$0xff] %vm297_vm3, %v2547_v32  ;;  %v396_v14 = vld [vmem:[#allocation2 + $0x110] sm:$0xff] }
  0x41   : > { %2069 = vmatmul.msk.bf16.gmra.mxu0 %vm665_vm2, %v2106_v16  ;;  %2077 = vmatmul.msk.bf16.gmra.mxu1 %vm665_vm2, %v2114_v17  ;;  %340 = vst.msk [vmem:[#allocation2 + $0x150] sm:$0xff] %vm297_vm3, %v2547_v32 }
  0x42   : > { %2085 = vmatmul.msk.bf16.gmra.mxu2 %vm665_vm2, %v2122_v18  ;;  %2093 = vmatmul.msk.bf16.gmra.mxu3 %vm665_vm2, %v2130_v19  ;;  %341 = vst.msk [vmem:[#allocation2 + $0x158] sm:$0xff] %vm297_vm3, %v2547_v32 }
  0x43   : > { %342 = vst.msk [vmem:[#allocation2 + $0x160] sm:$0xff] %vm297_vm3, %v2547_v32 }
  0x44   : > { %343 = vst.msk [vmem:[#allocation2 + $0x168] sm:$0xff] %vm297_vm3, %v2547_v32 }
  0x45   : > { %344 = vst.msk [vmem:[#allocation2 + $0x170] sm:$0xff] %vm297_vm3, %v2547_v32 }
  0x46   : > { %345 = vst.msk [vmem:[#allocation2 + $0x178] sm:$0xff] %vm297_vm3, %v2547_v32 }
  0x47   : > { %346 = vst.msk [vmem:[#allocation2 + $0x180] sm:$0xff] %vm297_vm3, %v2547_v32 }
  0x48   : > { %347 = vst.msk [vmem:[#allocation2 + $0x188] sm:$0xff] %vm297_vm3, %v2547_v32 }
  0x49   : > { %348 = vst.msk [vmem:[#allocation2 + $0x190] sm:$0xff] %vm297_vm3, %v2547_v32 }
  0x4a   : > { %349 = vst.msk [vmem:[#allocation2 + $0x198] sm:$0xff] %vm297_vm3, %v2547_v32 }
  0x4b   : > { %350 = vst.msk [vmem:[#allocation2 + $0x1a0] sm:$0xff] %vm297_vm3, %v2547_v32 }
  0x4c   : > { %351 = vst.msk [vmem:[#allocation2 + $0x1a8] sm:$0xff] %vm297_vm3, %v2547_v32 }
  0x4d   : > { %352 = vst.msk [vmem:[#allocation2 + $0x1b0] sm:$0xff] %vm297_vm3, %v2547_v32 }
  0x4e   : > { %353 = vst.msk [vmem:[#allocation2 + $0x1b8] sm:$0xff] %vm297_vm3, %v2547_v32  ;;  %v410_v62 = vld [vmem:[#allocation2 + $0x180] sm:$0xff] }
  0x4f   : > { %354 = vst.msk [vmem:[#allocation2 + $0x1c0] sm:$0xff] %vm297_vm3, %v2547_v32  ;;  %v411_v6 = vld [vmem:[#allocation2 + $0x188] sm:$0xff] }
  0x50   : > { %355 = vst.msk [vmem:[#allocation2 + $0x1c8] sm:$0xff] %vm297_vm3, %v2547_v32  ;;  %v412_v19 = vld [vmem:[#allocation2 + $0x190] sm:$0xff] }
  0x51   : > { %2070 = vmatmul.msk.bf16.gmra.mxu0 %vm665_vm2, %v2107_v20  ;;  %2078 = vmatmul.msk.bf16.gmra.mxu1 %vm665_vm2, %v2115_v21  ;;  %356 = vst.msk [vmem:[#allocation2 + $0x1d0] sm:$0xff] %vm297_vm3, %v2547_v32 }
  0x52   : > { %2086 = vmatmul.msk.bf16.gmra.mxu2 %vm665_vm2, %v2123_v22  ;;  %2094 = vmatmul.msk.bf16.gmra.mxu3 %vm665_vm2, %v2131_v23  ;;  %357 = vst.msk [vmem:[#allocation2 + $0x1d8] sm:$0xff] %vm297_vm3, %v2547_v32  ;;  %v365_v22 = vld [vmem:[#allocation2 + $0x18] sm:$0xff] }
  0x53   : > { %358 = vst.msk [vmem:[#allocation2 + $0x1e0] sm:$0xff] %vm297_vm3, %v2547_v32 }
  0x54   : > { %359 = vst.msk [vmem:[#allocation2 + $0x1e8] sm:$0xff] %vm297_vm3, %v2547_v32 }
  0x55   : > { %360 = vst.msk [vmem:[#allocation2 + $0x1f0] sm:$0xff] %vm297_vm3, %v2547_v32 }
  0x56   : > { %361 = vst.msk [vmem:[#allocation2 + $0x1f8] sm:$0xff] %vm297_vm3, %v2547_v32 }
  0x61   : > { %2071 = vmatmul.msk.bf16.gmra.mxu0 %vm665_vm2, %v2108_v24  ;;  %2079 = vmatmul.msk.bf16.gmra.mxu1 %vm665_vm2, %v2116_v25  ;;  %v381_v24 = vld [vmem:[#allocation2 + $0x98] sm:$0xff] }
  0x62   : > { %2087 = vmatmul.msk.bf16.gmra.mxu2 %vm665_vm2, %v2124_v26  ;;  %2095 = vmatmul.msk.bf16.gmra.mxu3 %vm665_vm2, %v2132_v27 }
  0x71   : > { %2072 = vmatmul.msk.bf16.gmra.mxu0 %vm665_vm2, %v2109_v28  ;;  %2080 = vmatmul.msk.bf16.gmra.mxu1 %vm665_vm2, %v2117_v29  ;;  %v397_v28 = vld [vmem:[#allocation2 + $0x118] sm:$0xff] }
  0x72   : > { %2088 = vmatmul.msk.bf16.gmra.mxu2 %vm665_vm2, %v2125_v30  ;;  %2096 = vmatmul.msk.bf16.gmra.mxu3 %vm665_vm2, %v2133_v31  ;;  %v413_v29 = vld [vmem:[#allocation2 + $0x198] sm:$0xff] }
  0x81   : > { %2073 = vmatmul.msk.bf16.gmra.mxu0 %vm665_vm2, %v2110_v33  ;;  %2081 = vmatmul.msk.bf16.gmra.mxu1 %vm665_vm2, %v2118_v34  ;;  %v366_v33 = vld [vmem:[#allocation2 + $0x20] sm:$0xff] }
  0x82   : > { %2089 = vmatmul.msk.bf16.gmra.mxu2 %vm665_vm2, %v2126_v35  ;;  %2097 = vmatmul.msk.bf16.gmra.mxu3 %vm665_vm2, %v2134_v36 }
  0x91   : > { %2074 = vmatmul.msk.bf16.gmra.mxu0 %vm665_vm2, %v2111_v37  ;;  %2082 = vmatmul.msk.bf16.gmra.mxu1 %vm665_vm2, %v2119_v38  ;;  %v382_v38 = vld [vmem:[#allocation2 + $0xa0] sm:$0xff] }
  0x92   : > { %2090 = vmatmul.msk.bf16.gmra.mxu2 %vm665_vm2, %v2127_v39  ;;  %2098 = vmatmul.msk.bf16.gmra.mxu3 %vm665_vm2, %v2135_v40 }
  0x9e   : > { %v778_v42 = vpop.f32.mrf.mxu0  ;;  %v818_v43 = vpop.f32.mrf.mxu1 }
  0x9f   : > { %v938_v44 = vadd.f32 %v778_v42, %v362_v41  ;;  %v954_v63 = vadd.f32 %v818_v43, %v378_v55 }
  0xa1   : > { %1003 = vst.msk [vmem:[#allocation2] sm:$0xff] %vm297_vm3, %v938_v44 }
  0xa2   : > { %1019 = vst.msk [vmem:[#allocation2 + $0x80] sm:$0xff] %vm297_vm3, %v954_v63 }
  0xa5   : > { %v858_v46 = vpop.f32.mrf.mxu2  ;;  %v898_v47 = vpop.f32.mrf.mxu3 }
  0xa6   : > { %v780_v48 = vpop.f32.mrf.mxu0  ;;  %v820_v49 = vpop.f32.mrf.mxu1  ;;  %v970_v1 = vadd.f32 %v858_v46, %v394_v58  ;;  %v986_v3 = vadd.f32 %v898_v47, %v410_v62 }
  0xa7   : > { %v939_v5 = vadd.f32 %v780_v48, %v363_v0  ;;  %v955_v7 = vadd.f32 %v820_v49, %v379_v2 }
  0xa8   : > { %v1070_v51 = vld [vmem:[#allocation2] sm:$0xff]  ;;  %1035 = vst.msk [vmem:[#allocation2 + $0x100] sm:$0xff] %vm297_vm3, %v970_v1 }
  0xa9   : > { %v1138_v52 = vmul.f32 %v2811_v45, %v1070_v51  ;;  %1051 = vst.msk [vmem:[#allocation2 + $0x180] sm:$0xff] %vm297_vm3, %v986_v3  ;;  %v1086_v26 = vld [vmem:[#allocation2 + $0x80] sm:$0xff] }
  0xaa   : > { %1004 = vst.msk [vmem:[#allocation2 + $0x8] sm:$0xff] %vm297_vm3, %v939_v5  ;;  %v1154_v30 = vmul.f32 %v2811_v45, %v1086_v26 }
  0xab   : > { %v2832_v53 = vadd.f32 %v2820_v50, %v1138_v52  ;;  %1020 = vst.msk [vmem:[#allocation2 + $0x88] sm:$0xff] %vm297_vm3, %v955_v7 }
  0xac   : > { %v2867_v39 = vadd.f32 %v2820_v50, %v1154_v30 }
  0xad   : > { %v1270_v54 = vsub.f32 0.0, %v2832_v53  ;;  %v860_v56 = vpop.f32.mrf.mxu2  ;;  %v900_v57 = vpop.f32.mrf.mxu3 }
  0xae   : > { %v783_v59 = vpop.f32.mrf.mxu0  ;;  %v823_v60 = vpop.f32.mrf.mxu1  ;;  %v971_v9 = vadd.f32 %v860_v56, %v395_v4  ;;  %v987_v13 = vadd.f32 %v900_v57, %v411_v6 }
  0xaf   : > { %v1334_v61 = vmul.f32 1.442695, %v1270_v54  ;;  %v940_v18 = vadd.f32 %v783_v59, %v364_v8  ;;  %v956_v21 = vadd.f32 %v823_v60, %v380_v10  ;;  %v1102_v31 = vld [vmem:[#allocation2 + $0x100] sm:$0xff]  ;;  %v1286_v54 = vsub.f32 0.0, %v2867_v39 }
  0xb0   : > { %1036 = vst.msk [vmem:[#allocation2 + $0x108] sm:$0xff] %vm297_vm3, %v971_v9  ;;  %v1170_v34 = vmul.f32 %v2811_v45, %v1102_v31  ;;  %v1118_v35 = vld [vmem:[#allocation2 + $0x180] sm:$0xff] }
  0xb1   : > { %2206 = vpow2.f32 %v1334_v61  ;;  %1052 = vst.msk [vmem:[#allocation2 + $0x188] sm:$0xff] %vm297_vm3, %v987_v13  ;;  %v1186_v40 = vmul.f32 %v2811_v45, %v1118_v35  ;;  %v1071_v41 = vld [vmem:[#allocation2 + $0x8] sm:$0xff]  ;;  %v1366_v0 = vmul.f32 1.442695, %v1286_v54 }
  0xb2   : > { %1005 = vst.msk [vmem:[#allocation2 + $0x10] sm:$0xff] %vm297_vm3, %v940_v18  ;;  %v2876_v47 = vadd.f32 %v2820_v50, %v1170_v34  ;;  %v1139_v48 = vmul.f32 %v2811_v45, %v1071_v41  ;;  %v1087_v49 = vld [vmem:[#allocation2 + $0x88] sm:$0xff] }
  0xb3   : > { %1021 = vst.msk [vmem:[#allocation2 + $0x90] sm:$0xff] %vm297_vm3, %v956_v21  ;;  %v2882_v55 = vadd.f32 %v2820_v50, %v1186_v40  ;;  %v1155_v56 = vmul.f32 %v2811_v45, %v1087_v49 }
  0xb4   : > { %v1302_v60 = vsub.f32 0.0, %v2876_v47  ;;  %v2889_v61 = vadd.f32 %v2820_v50, %v1139_v48 }
  0xb5   : > { %v863_v11 = vpop.f32.mrf.mxu2  ;;  %v903_v12 = vpop.f32.mrf.mxu3  ;;  %v1318_v1 = vsub.f32 0.0, %v2882_v55  ;;  %v2895_v2 = vadd.f32 %v2820_v50, %v1155_v56 }
  0xb6   : > { %v785_v15 = vpop.f32.mrf.mxu0  ;;  %v825_v16 = vpop.f32.mrf.mxu1  ;;  %v972_v23 = vadd.f32 %v863_v11, %v396_v14  ;;  %v988_v25 = vadd.f32 %v903_v12, %v412_v19  ;;  %v1398_v5 = vmul.f32 1.442695, %v1302_v60  ;;  %v1271_v6 = vsub.f32 0.0, %v2889_v61 }
  0xb7   : > { %v2207_v17 = vpop.eup %2206  ;;  %v941_v27 = vadd.f32 %v785_v15, %v365_v22  ;;  %v957_v32 = vadd.f32 %v825_v16, %v381_v24  ;;  %v1103_v57 = vld [vmem:[#allocation2 + $0x108] sm:$0xff]  ;;  %v1430_v9 = vmul.f32 1.442695, %v1318_v1  ;;  %v1287_v10 = vsub.f32 0.0, %v2895_v2 }
  0xb8   : > { %v1462_v20 = vadd.f32 1.0, %v2207_v17  ;;  %1037 = vst.msk [vmem:[#allocation2 + $0x110] sm:$0xff] %vm297_vm3, %v972_v23  ;;  %v1171_v62 = vmul.f32 %v2811_v45, %v1103_v57  ;;  %v1119_v63 = vld [vmem:[#allocation2 + $0x188] sm:$0xff]  ;;  %v1336_v13 = vmul.f32 1.442695, %v1271_v6 }
  0xb9   : > { %1053 = vst.msk [vmem:[#allocation2 + $0x190] sm:$0xff] %vm297_vm3, %v988_v25  ;;  %v1187_v3 = vmul.f32 %v2811_v45, %v1119_v63  ;;  %v1368_v19 = vmul.f32 1.442695, %v1287_v10 }
  0xba   : > { %2208 = vrcp.f32 %v1462_v20  ;;  %1006 = vst.msk [vmem:[#allocation2 + $0x18] sm:$0xff] %vm297_vm3, %v941_v27  ;;  %v2901_v7 = vadd.f32 %v2820_v50, %v1171_v62  ;;  %v1088_v8 = vld [vmem:[#allocation2 + $0x90] sm:$0xff] }
  0xbb   : > { %1022 = vst.msk [vmem:[#allocation2 + $0x98] sm:$0xff] %vm297_vm3, %v957_v32  ;;  %2210 = vpow2.f32 %v1366_v0  ;;  %v2906_v11 = vadd.f32 %v2820_v50, %v1187_v3  ;;  %v1156_v21 = vmul.f32 %v2811_v45, %v1088_v8 }
  0xbc   : > { %2212 = vpow2.f32 %v1398_v5  ;;  %v1303_v14 = vsub.f32 0.0, %v2901_v7 }
  0xbd   : > { %v865_v36 = vpop.f32.mrf.mxu2  ;;  %v905_v37 = vpop.f32.mrf.mxu3  ;;  %2214 = vpow2.f32 %v1430_v9  ;;  %v1319_v20 = vsub.f32 0.0, %v2906_v11  ;;  %v2931_v30 = vadd.f32 %v2820_v50, %v1156_v21  ;;  %v414_v21 = vld [vmem:[#allocation2 + $0x1a0] sm:$0xff] }
  0xbe   : > { %v973_v42 = vadd.f32 %v865_v36, %v397_v28  ;;  %v989_v43 = vadd.f32 %v905_v37, %v413_v29  ;;  %v788_v44 = vpop.f32.mrf.mxu0  ;;  %v828_v46 = vpop.f32.mrf.mxu1  ;;  %2216 = vpow2.f32 %v1336_v13  ;;  %v1400_v25 = vmul.f32 1.442695, %v1303_v14  ;;  %v398_v14 = vld [vmem:[#allocation2 + $0x120] sm:$0xff] }
  0xbf   : > { %v942_v51 = vadd.f32 %v788_v44, %v366_v33  ;;  %v958_v58 = vadd.f32 %v828_v46, %v382_v38  ;;  %v1104_v12 = vld [vmem:[#allocation2 + $0x110] sm:$0xff]  ;;  %2218 = vpow2.f32 %v1368_v19  ;;  %v1432_v29 = vmul.f32 1.442695, %v1319_v20 }
  0xc0   : > { %v2209_v52 = vpop.eup %2208  ;;  %1038 = vst.msk [vmem:[#allocation2 + $0x118] sm:$0xff] %vm297_vm3, %v973_v42  ;;  %v1120_v16 = vld [vmem:[#allocation2 + $0x190] sm:$0xff]  ;;  %v1172_v27 = vmul.f32 %v2811_v45, %v1104_v12  ;;  %2220 = vpow2.f32 %v1400_v25  ;;  %v1288_v36 = vsub.f32 0.0, %v2931_v30 }
  0xc1   : > { %v1590_v59 = vmul.f32 %v2209_v52, %v2832_v53  ;;  %v1072_v53 = vld [vmem:[#allocation2 + $0x10] sm:$0xff]  ;;  %1054 = vst.msk [vmem:[#allocation2 + $0x198] sm:$0xff] %vm297_vm3, %v989_v43  ;;  %v1073_v22 = vld [vmem:[#allocation2 + $0x18] sm:$0xff]  ;;  %v1188_v31 = vmul.f32 %v2811_v45, %v1120_v16  ;;  %v2211_v35 = vpop.eup %2210  ;;  %2222 = vpow2.f32 %v1432_v29 }
  0xc2   : > { %1007 = vst.msk [vmem:[#allocation2 + $0x20] sm:$0xff] %vm297_vm3, %v942_v51  ;;  %v1140_v15 = vmul.f32 %v2811_v45, %v1072_v53  ;;  %v1089_v28 = vld [vmem:[#allocation2 + $0x98] sm:$0xff]  ;;  %v2936_v33 = vadd.f32 %v2820_v50, %v1172_v27  ;;  %v1141_v34 = vmul.f32 %v2811_v45, %v1073_v22  ;;  %v2213_v40 = vpop.eup %2212  ;;  %v1478_v41 = vadd.f32 1.0, %v2211_v35 }
  0xc3   : > { %v1654_v4 = vpack.c.bf16 %v1590_v59, %v1590_v59  ;;  %1023 = vst.msk [vmem:[#allocation2 + $0xa0] sm:$0xff] %vm297_vm3, %v958_v58  ;;  %v2941_v37 = vadd.f32 %v2820_v50, %v1188_v31  ;;  %v1157_v38 = vmul.f32 %v2811_v45, %v1089_v28  ;;  %v2215_v46 = vpop.eup %2214  ;;  %v1494_v48 = vadd.f32 1.0, %v2213_v40 }
  0xc4   : > { %v2927_v26 = vadd.f32 %v2820_v50, %v1140_v15  ;;  %v1304_v43 = vsub.f32 0.0, %v2936_v33  ;;  %v2946_v44 = vadd.f32 %v2820_v50, %v1141_v34  ;;  %v1370_v49 = vmul.f32 1.442695, %v1288_v36  ;;  %v2217_v56 = vpop.eup %2216 }
  0xc5   : > { %1719 = vst.msk [vmem:[%s2910_s30] sm:$0xf] %vm1718_vm4, %v1654_v4  ;;  %v2916_v17 = vpop.f32.mrf.mxu2  ;;  %v2918_v18 = vpop.f32.mrf.mxu3  ;;  %v1320_v51 = vsub.f32 0.0, %v2941_v37  ;;  %v2950_v52 = vadd.f32 %v2820_v50, %v1157_v38  ;;  %2224 = vrcp.f32 %v1478_v41  ;;  %v1510_v57 = vadd.f32 1.0, %v2215_v46 }
  0xc6   : > { %v2922_v23 = vpop.f32.mrf.mxu0  ;;  %v2924_v24 = vpop.f32.mrf.mxu1  ;;  %v1272_v32 = vsub.f32 0.0, %v2927_v26  ;;  %v1402_v58 = vmul.f32 1.442695, %v1304_v43  ;;  %v1273_v59 = vsub.f32 0.0, %v2946_v44  ;;  %2226 = vrcp.f32 %v1494_v48 }
  0xc7   : > { %v1105_v54 = vld [vmem:[#allocation2 + $0x118] sm:$0xff]  ;;  %v2219_v0 = vpop.eup %2218  ;;  %v1463_v1 = vadd.f32 1.0, %v2217_v56  ;;  %v1434_v3 = vmul.f32 1.442695, %v1320_v51  ;;  %v1289_v53 = vsub.f32 0.0, %v2950_v52  ;;  %2228 = vrcp.f32 %v1510_v57 }
  0xc8   : > { %v1338_v42 = vmul.f32 1.442695, %v1272_v32  ;;  %v1121_v60 = vld [vmem:[#allocation2 + $0x198] sm:$0xff]  ;;  %v2221_v8 = vpop.eup %2220  ;;  %v1479_v9 = vadd.f32 1.0, %v2219_v0  ;;  %v1340_v10 = vmul.f32 1.442695, %v1273_v59  ;;  %v1173_v12 = vmul.f32 %v2811_v45, %v1105_v54 }
  0xc9   : > { %v1074_v4 = vld [vmem:[#allocation2 + $0x20] sm:$0xff]  ;;  %v2223_v15 = vpop.eup %2222  ;;  %2230 = vrcp.f32 %v1463_v1  ;;  %v1495_v16 = vadd.f32 1.0, %v2221_v8  ;;  %v1372_v19 = vmul.f32 1.442695, %v1289_v53  ;;  %v1189_v20 = vmul.f32 %v2811_v45, %v1121_v60  ;;  %v367_v59 = vld [vmem:[#allocation2 + $0x28] sm:$0xff] }
  0xca   : > { %v1090_v13 = vld [vmem:[#allocation2 + $0xa0] sm:$0xff]  ;;  %2232 = vrcp.f32 %v1479_v9  ;;  %v1511_v22 = vadd.f32 1.0, %v2223_v15  ;;  %v2965_v25 = vadd.f32 %v2820_v50, %v1173_v12  ;;  %v1142_v27 = vmul.f32 %v2811_v45, %v1074_v4  ;;  %v383_v9 = vld [vmem:[#allocation2 + $0xa8] sm:$0xff] }
  0xcb   : > { %2234 = vrcp.f32 %v1495_v16  ;;  %v2969_v28 = vadd.f32 %v2820_v50, %v1189_v20  ;;  %v1158_v29 = vmul.f32 %v2811_v45, %v1090_v13  ;;  %v974_v31 = vadd.f32 %v2916_v17, %v398_v14  ;;  %v2225_v32 = vpop.eup %2224  ;;  %v399_v16 = vld [vmem:[#allocation2 + $0x128] sm:$0xff] }
  0xcc   : > { %2236 = vrcp.f32 %v1511_v22  ;;  %v1305_v34 = vsub.f32 0.0, %v2965_v25  ;;  %v2975_v35 = vadd.f32 %v2820_v50, %v1142_v27  ;;  %v990_v36 = vadd.f32 %v2918_v18, %v414_v21  ;;  %v2227_v38 = vpop.eup %2226  ;;  %v415_v22 = vld [vmem:[#allocation2 + $0x1a8] sm:$0xff] }
  0xcd   : > { %v2953_v62 = vpop.f32.mrf.mxu2  ;;  %v2955_v63 = vpop.f32.mrf.mxu3  ;;  %v1606_v40 = vmul.f32 %v2225_v32, %v2867_v39  ;;  %2238 = vpow2.f32 %v1338_v42  ;;  %v1321_v41 = vsub.f32 0.0, %v2969_v28  ;;  %v2981_v43 = vadd.f32 %v2820_v50, %v1158_v29  ;;  %1039 = vst.msk [vmem:[#allocation2 + $0x120] sm:$0xff] %vm297_vm3, %v974_v31 }
  0xce   : > { %v2958_v5 = vpop.f32.mrf.mxu0  ;;  %v2960_v6 = vpop.f32.mrf.mxu1  ;;  %v1622_v46 = vmul.f32 %v2227_v38, %v2876_v47  ;;  %2240 = vpow2.f32 %v1370_v49  ;;  %v1404_v48 = vmul.f32 1.442695, %v1305_v34  ;;  %v1274_v51 = vsub.f32 0.0, %v2975_v35  ;;  %1055 = vst.msk [vmem:[#allocation2 + $0x1a0] sm:$0xff] %vm297_vm3, %v990_v36  ;;  %v368_v34 = vld [vmem:[#allocation2 + $0x30] sm:$0xff] }
  0xcf   : > { %v2229_v17 = vpop.eup %2228  ;;  %v1670_v54 = vpack.c.bf16 %v1606_v40, %v1606_v40  ;;  %2242 = vpow2.f32 %v1402_v58  ;;  %v1436_v57 = vmul.f32 1.442695, %v1321_v41  ;;  %v1290_v58 = vsub.f32 0.0, %v2981_v43  ;;  %v384_v41 = vld [vmem:[#allocation2 + $0xb0] sm:$0xff] }
  0xd0   : > { %v2231_v42 = vpop.eup %2230  ;;  %v1638_v56 = vmul.f32 %v2229_v17, %v2882_v55  ;;  %v1686_v0 = vpack.c.bf16 %v1622_v46, %v1622_v46  ;;  %2244 = vpow2.f32 %v1434_v3  ;;  %v1342_v53 = vmul.f32 1.442695, %v1274_v51 }
  0xd1   : > { %v2233_v60 = vpop.eup %2232  ;;  %v1591_v1 = vmul.f32 %v2231_v42, %v2889_v61  ;;  %1735 = vst.msk [vmem:[%s2910_s30 + $0x40] sm:$0xf] %vm1718_vm4, %v1670_v54  ;;  %2246 = vpow2.f32 %v1340_v10  ;;  %v943_v3 = vadd.f32 %v2922_v23, %v367_v59  ;;  %v3008_v10 = vmul.f32 1.442695, %v1290_v58  ;;  %v369_v58 = vld [vmem:[#allocation2 + $0x38] sm:$0xff] }
  0xd2   : > { %v2235_v4 = vpop.eup %2234  ;;  %v1702_v8 = vpack.c.bf16 %v1638_v56, %v1638_v56  ;;  %v1607_v55 = vmul.f32 %v2233_v60, %v2895_v2  ;;  %1751 = vst.msk [vmem:[%s2910_s30 + $0x80] sm:$0xf] %vm1718_vm4, %v1686_v0  ;;  %2248 = vpow2.f32 %v1372_v19  ;;  %v959_v23 = vadd.f32 %v2924_v24, %v383_v9  ;;  %v400_v56 = vld [vmem:[#allocation2 + $0x130] sm:$0xff] }
  0xd3   : > { %v2237_v12 = vpop.eup %2236  ;;  %v1655_v13 = vpack.c.bf16 %v1591_v1, %v1591_v1  ;;  %v1623_v61 = vmul.f32 %v2235_v4, %v2901_v7  ;;  %2250 = vpow2.f32 %v1404_v48  ;;  %v975_v24 = vadd.f32 %v2953_v62, %v399_v16  ;;  %1008 = vst.msk [vmem:[#allocation2 + $0x28] sm:$0xff] %vm297_vm3, %v943_v3  ;;  %v401_v3 = vld [vmem:[#allocation2 + $0x138] sm:$0xff] }
  0xd4   : > { %v2239_v14 = vpop.eup %2238  ;;  %1767 = vst.msk [vmem:[%s2910_s30 + $0xc0] sm:$0xf] %vm1718_vm4, %v1702_v8  ;;  %v1671_v15 = vpack.c.bf16 %v1607_v55, %v1607_v55  ;;  %v1639_v2 = vmul.f32 %v2237_v12, %v2906_v11  ;;  %2252 = vpow2.f32 %v1436_v57  ;;  %v1106_v19 = vld [vmem:[#allocation2 + $0x120] sm:$0xff]  ;;  %v991_v54 = vadd.f32 %v2955_v63, %v415_v22  ;;  %v417_v16 = vld [vmem:[#allocation2 + $0x1b8] sm:$0xff] }
  0xd5   : > { %v2987_v18 = vpop.f32.mrf.mxu2  ;;  %v2989_v39 = vpop.f32.mrf.mxu3  ;;  %1720 = vst.msk [vmem:[%s2910_s30 + $0x4] sm:$0xf] %vm1718_vm4, %v1655_v13  ;;  %v1687_v21 = vpack.c.bf16 %v1623_v61, %v1623_v61  ;;  %v1464_v7 = vadd.f32 1.0, %v2239_v14  ;;  %2254 = vpow2.f32 %v1342_v53  ;;  %v1174_v31 = vmul.f32 %v2811_v45, %v1106_v19  ;;  %v1122_v32 = vld [vmem:[#allocation2 + $0x1a0] sm:$0xff]  ;;  %v416_v53 = vld [vmem:[#allocation2 + $0x1b0] sm:$0xff]  ;;  %v385_v61 = vld [vmem:[#allocation2 + $0xb8] sm:$0xff] }
  0xd6   : > { %v2992_v47 = vpop.f32.mrf.mxu0  ;;  %v2994_v49 = vpop.f32.mrf.mxu1  ;;  %1736 = vst.msk [vmem:[%s2910_s30 + $0x44] sm:$0xf] %vm1718_vm4, %v1671_v15  ;;  %v1703_v29 = vpack.c.bf16 %v1639_v2, %v1639_v2  ;;  %v1190_v40 = vmul.f32 %v2811_v45, %v1122_v32  ;;  %v944_v1 = vadd.f32 %v2958_v5, %v368_v34  ;;  %v960_v63 = vadd.f32 %v2960_v6, %v384_v41 }
  0xd7   : > { %v2241_v20 = vpop.eup %2240  ;;  %1752 = vst.msk [vmem:[%s2910_s30 + $0x84] sm:$0xf] %vm1718_vm4, %v1687_v21  ;;  %2256 = vrcp.f32 %v1464_v7  ;;  %v3023_v42 = vadd.f32 %v2820_v50, %v1174_v31  ;;  %v976_v5 = vadd.f32 %v2987_v18, %v400_v56  ;;  %v992_v6 = vadd.f32 %v2989_v39, %v416_v53 }
  0xd8   : > { %v2243_v27 = vpop.eup %2242  ;;  %v1480_v11 = vadd.f32 1.0, %v2241_v20  ;;  %1768 = vst.msk [vmem:[%s2910_s30 + $0xc4] sm:$0xf] %vm1718_vm4, %v1703_v29  ;;  %v3027_v62 = vadd.f32 %v2820_v50, %v1190_v40  ;;  %v370_v20 = vld [vmem:[#allocation2 + $0x40] sm:$0xff]  ;;  %v945_v18 = vadd.f32 %v2992_v47, %v369_v58  ;;  %v3044_v29 = vadd.f32 %v2994_v49, %v385_v61 }
  0xd9   : > { %v2245_v36 = vpop.eup %2244  ;;  %v1496_v38 = vadd.f32 1.0, %v2243_v27  ;;  %v1306_v55 = vsub.f32 0.0, %v3023_v42  ;;  %1024 = vst.msk [vmem:[#allocation2 + $0xa8] sm:$0xff] %vm297_vm3, %v959_v23  ;;  %v386_v23 = vld [vmem:[#allocation2 + $0xc0] sm:$0xff] }
  0xda   : > { %v2247_v48 = vpop.eup %2246  ;;  %2258 = vrcp.f32 %v1480_v11  ;;  %v1512_v51 = vadd.f32 1.0, %v2245_v36  ;;  %v1322_v13 = vsub.f32 0.0, %v3027_v62  ;;  %1040 = vst.msk [vmem:[#allocation2 + $0x128] sm:$0xff] %vm297_vm3, %v975_v24  ;;  %v1075_v40 = vld [vmem:[#allocation2 + $0x28] sm:$0xff] }
  0xdb   : > { %v2249_v60 = vpop.eup %2248  ;;  %2260 = vrcp.f32 %v1496_v38  ;;  %v1465_v0 = vadd.f32 1.0, %v2247_v48  ;;  %v1406_v2 = vmul.f32 1.442695, %v1306_v55  ;;  %1056 = vst.msk [vmem:[#allocation2 + $0x1a8] sm:$0xff] %vm297_vm3, %v991_v54 }
  0xdc   : > { %v2251_v4 = vpop.eup %2250  ;;  %2262 = vrcp.f32 %v1512_v51  ;;  %v1481_v8 = vadd.f32 1.0, %v2249_v60  ;;  %v1438_v19 = vmul.f32 1.442695, %v1322_v13  ;;  %1009 = vst.msk [vmem:[#allocation2 + $0x30] sm:$0xff] %vm297_vm3, %v944_v1  ;;  %v1143_v51 = vmul.f32 %v2811_v45, %v1075_v40 }
  0xdd   : > { %v875_v17 = vpop.f32.mrf.mxu2  ;;  %v915_v46 = vpop.f32.mrf.mxu3  ;;  %2264 = vrcp.f32 %v1465_v0  ;;  %v1497_v12 = vadd.f32 1.0, %v2251_v4  ;;  %1025 = vst.msk [vmem:[#allocation2 + $0xb0] sm:$0xff] %vm297_vm3, %v960_v63 }
  0xde   : > { %v798_v57 = vpop.f32.mrf.mxu0  ;;  %v838_v59 = vpop.f32.mrf.mxu1  ;;  %2266 = vrcp.f32 %v1481_v8  ;;  %v3046_v39 = vadd.f32 %v875_v17, %v401_v3  ;;  %1041 = vst.msk [vmem:[#allocation2 + $0x130] sm:$0xff] %vm297_vm3, %v976_v5  ;;  %v3050_v32 = vadd.f32 %v915_v46, %v417_v16  ;;  %v3078_v1 = vadd.f32 %v2820_v50, %v1143_v51 }
  0xdf   : > { %v2253_v9 = vpop.eup %2252  ;;  %2268 = vrcp.f32 %v1497_v12  ;;  %v3052_v47 = vadd.f32 %v798_v57, %v370_v20  ;;  %1057 = vst.msk [vmem:[#allocation2 + $0x1b0] sm:$0xff] %vm297_vm3, %v992_v6 }
  0xe0   : > { %v2255_v14 = vpop.eup %2254  ;;  %v1513_v15 = vadd.f32 1.0, %v2253_v9  ;;  %1010 = vst.msk [vmem:[#allocation2 + $0x38] sm:$0xff] %vm297_vm3, %v945_v18  ;;  %v1275_v13 = vsub.f32 0.0, %v3078_v1  ;;  %v402_v18 = vld [vmem:[#allocation2 + $0x140] sm:$0xff] }
  0xe1   : > { %v2257_v21 = vpop.eup %2256  ;;  %v1466_v7 = vadd.f32 1.0, %v2255_v14  ;;  %1026 = vst.msk [vmem:[#allocation2 + $0xb8] sm:$0xff] %vm297_vm3, %v3044_v29 }
  0xe2   : > { %v2259_v22 = vpop.eup %2258  ;;  %v1592_v27 = vmul.f32 %v2257_v21, %v2927_v26  ;;  %2270 = vrcp.f32 %v1513_v15  ;;  %v1123_v4 = vld [vmem:[#allocation2 + $0x1a8] sm:$0xff]  ;;  %1042 = vst.msk [vmem:[#allocation2 + $0x138] sm:$0xff] %vm297_vm3, %v3046_v39 }
  0xe3   : > { %v2261_v11 = vpop.eup %2260  ;;  %v1608_v31 = vmul.f32 %v2259_v22, %v2931_v30  ;;  %2272 = vrcp.f32 %v1466_v7  ;;  %v3061_v30 = vadd.f32 %v838_v59, %v386_v23  ;;  %v1107_v59 = vld [vmem:[#allocation2 + $0x128] sm:$0xff]  ;;  %v1191_v58 = vmul.f32 %v2811_v45, %v1123_v4  ;;  %1058 = vst.msk [vmem:[#allocation2 + $0x1b8] sm:$0xff] %vm297_vm3, %v3050_v32 }
  0xe4   : > { %v2263_v36 = vpop.eup %2262  ;;  %v1656_v38 = vpack.c.bf16 %v1592_v27, %v1592_v27  ;;  %v1624_v49 = vmul.f32 %v2261_v11, %v2936_v33  ;;  %2274 = vpow2.f32 %v3008_v10  ;;  %v1091_v33 = vld [vmem:[#allocation2 + $0xa8] sm:$0xff]  ;;  %v1175_v53 = vmul.f32 %v2811_v45, %v1107_v59  ;;  %v1092_v6 = vld [vmem:[#allocation2 + $0xb0] sm:$0xff]  ;;  %1011 = vst.msk [vmem:[#allocation2 + $0x40] sm:$0xff] %vm297_vm3, %v3052_v47 }
  0xe5   : > { %v3054_v34 = vpop.f32.mrf.mxu2  ;;  %v3056_v26 = vpop.f32.mrf.mxu3  ;;  %v1672_v46 = vpack.c.bf16 %v1608_v31, %v1608_v31  ;;  %v1640_v48 = vmul.f32 %v2263_v36, %v2941_v37  ;;  %2276 = vpow2.f32 %v1406_v2  ;;  %v1159_v57 = vmul.f32 %v2811_v45, %v1091_v33  ;;  %v1076_v2 = vld [vmem:[#allocation2 + $0x30] sm:$0xff]  ;;  %1027 = vst.msk [vmem:[#allocation2 + $0xc0] sm:$0xff] %vm297_vm3, %v3061_v30  ;;  %v387_v32 = vld [vmem:[#allocation2 + $0xc8] sm:$0xff] }
  0xe6   : > { %v3063_v24 = vpop.f32.mrf.mxu0  ;;  %v3065_v41 = vpop.f32.mrf.mxu1  ;;  %1721 = vst.msk [vmem:[%s2910_s30 + $0x8] sm:$0xf] %vm1718_vm4, %v1656_v38  ;;  %v1688_v54 = vpack.c.bf16 %v1624_v49, %v1624_v49  ;;  %2278 = vpow2.f32 %v1438_v19  ;;  %v3093_v5 = vadd.f32 %v2820_v50, %v1175_v53  ;;  %v3100_v15 = vadd.f32 %v2820_v50, %v1191_v58 }
  0xe7   : > { %v2265_v17 = vpop.eup %2264  ;;  %1737 = vst.msk [vmem:[%s2910_s30 + $0x48] sm:$0xf] %vm1718_vm4, %v1672_v46  ;;  %v1704_v37 = vpack.c.bf16 %v1640_v48, %v1640_v48  ;;  %v3085_v63 = vadd.f32 %v2820_v50, %v1159_v57  ;;  %v1344_v7 = vmul.f32 1.442695, %v1275_v13  ;;  %v1144_v40 = vmul.f32 %v2811_v45, %v1076_v2 }
  0xe8   : > { %v2267_v10 = vpop.eup %2266  ;;  %v1593_v56 = vmul.f32 %v2265_v17, %v2946_v44  ;;  %1753 = vst.msk [vmem:[%s2910_s30 + $0x88] sm:$0xf] %vm1718_vm4, %v1688_v54  ;;  %v1307_v19 = vsub.f32 0.0, %v3093_v5  ;;  %v1323_v36 = vsub.f32 0.0, %v3100_v15  ;;  %v1124_v17 = vld [vmem:[#allocation2 + $0x1b0] sm:$0xff]  ;;  %v1160_v33 = vmul.f32 %v2811_v45, %v1092_v6  ;;  %v1077_v54 = vld [vmem:[#allocation2 + $0x38] sm:$0xff] }
  0xe9   : > { %v2269_v60 = vpop.eup %2268  ;;  %v1609_v0 = vmul.f32 %v2267_v10, %v2950_v52  ;;  %1769 = vst.msk [vmem:[%s2910_s30 + $0xc8] sm:$0xf] %vm1718_vm4, %v1704_v37  ;;  %v1291_v14 = vsub.f32 0.0, %v3085_v63  ;;  %v1192_v57 = vmul.f32 %v2811_v45, %v1124_v17  ;;  %v1145_v59 = vmul.f32 %v2811_v45, %v1077_v54 }
  0xea   : > { %v2271_v8 = vpop.eup %2270  ;;  %v1657_v44 = vpack.c.bf16 %v1593_v56, %v1593_v56  ;;  %v1625_v55 = vmul.f32 %v2269_v60, %v2965_v25  ;;  %v1408_v49 = vmul.f32 1.442695, %v1307_v19  ;;  %v1440_v51 = vmul.f32 1.442695, %v1323_v36  ;;  %v418_v60 = vld [vmem:[#allocation2 + $0x1c0] sm:$0xff]  ;;  %v1093_v19 = vld [vmem:[#allocation2 + $0xb8] sm:$0xff] }
  0xeb   : > { %v2273_v9 = vpop.eup %2272  ;;  %v1673_v52 = vpack.c.bf16 %v1609_v0, %v1609_v0  ;;  %v1641_v12 = vmul.f32 %v2271_v8, %v2969_v28  ;;  %v1108_v28 = vld [vmem:[#allocation2 + $0x130] sm:$0xff]  ;;  %v1376_v31 = vmul.f32 1.442695, %v1291_v14  ;;  %v3124_v56 = vadd.f32 %v2820_v50, %v1144_v40 }
  0xec   : > { %v2275_v61 = vpop.eup %2274  ;;  %1722 = vst.msk [vmem:[%s2910_s30 + $0xc] sm:$0xf] %vm1718_vm4, %v1657_v44  ;;  %v1689_v25 = vpack.c.bf16 %v1625_v55, %v1625_v55  ;;  %v1594_v3 = vmul.f32 %v2273_v9, %v2975_v35  ;;  %v1176_v10 = vmul.f32 %v2811_v45, %v1108_v28  ;;  %v3131_v37 = vadd.f32 %v2820_v50, %v1160_v33  ;;  %v371_v44 = vld [vmem:[#allocation2 + $0x48] sm:$0xff]  ;;  %v1078_v33 = vld [vmem:[#allocation2 + $0x40] sm:$0xff] }
  0xed   : > { %v2277_v16 = vpop.eup %2276  ;;  %1738 = vst.msk [vmem:[%s2910_s30 + $0x4c] sm:$0xf] %vm1718_vm4, %v1673_v52  ;;  %v1705_v20 = vpack.c.bf16 %v1641_v12, %v1641_v12  ;;  %v1482_v21 = vadd.f32 1.0, %v2275_v61  ;;  %v3105_v35 = vpop.f32.mrf.mxu2  ;;  %v978_v53 = vadd.f32 %v3054_v34, %v402_v18  ;;  %v1276_v4 = vsub.f32 0.0, %v3124_v56 }
  0xee   : > { %v3107_v23 = vpop.f32.mrf.mxu3  ;;  %v2279_v22 = vpop.eup %2278  ;;  %1754 = vst.msk [vmem:[%s2910_s30 + $0x8c] sm:$0xf] %vm1718_vm4, %v1689_v25  ;;  %v1658_v27 = vpack.c.bf16 %v1594_v3, %v1594_v3  ;;  %v1498_v11 = vadd.f32 1.0, %v2277_v16  ;;  %v3134_v0 = vadd.f32 %v2820_v50, %v1176_v10  ;;  %v3141_v8 = vadd.f32 %v2820_v50, %v1192_v57 }
  0xef   : > { %1770 = vst.msk [vmem:[%s2910_s30 + $0xcc] sm:$0xf] %vm1718_vm4, %v1705_v20  ;;  %2280 = vrcp.f32 %v1482_v21  ;;  %v1514_v38 = vadd.f32 1.0, %v2279_v22  ;;  %v3115_v46 = vpop.f32.mrf.mxu0  ;;  %v3117_v48 = vpop.f32.mrf.mxu1  ;;  %v3144_v29 = vadd.f32 %v2820_v50, %v1145_v59  ;;  %v1292_v55 = vsub.f32 0.0, %v3131_v37  ;;  %v1094_v59 = vld [vmem:[#allocation2 + $0xc0] sm:$0xff] }
  0xf0   : > { %1723 = vst.msk [vmem:[%s2910_s30 + $0x10] sm:$0xf] %vm1718_vm4, %v1658_v27  ;;  %2282 = vrcp.f32 %v1498_v11  ;;  %v1308_v39 = vsub.f32 0.0, %v3134_v0  ;;  %v994_v34 = vadd.f32 %v3056_v26, %v418_v60  ;;  %v1346_v9 = vmul.f32 1.442695, %v1276_v4  ;;  %v1109_v11 = vld [vmem:[#allocation2 + $0x138] sm:$0xff] }
  0xf1   : > { %2284 = vrcp.f32 %v1514_v38  ;;  %v1324_v52 = vsub.f32 0.0, %v3141_v8  ;;  %v1277_v12 = vsub.f32 0.0, %v3144_v29  ;;  %v1378_v3 = vmul.f32 1.442695, %v1292_v55  ;;  %1043 = vst.msk [vmem:[#allocation2 + $0x140] sm:$0xff] %vm297_vm3, %v978_v53 }
  0xf2   : > { %2286 = vpow2.f32 %v1344_v7  ;;  %v1410_v26 = vmul.f32 1.442695, %v1308_v39  ;;  %v947_v14 = vadd.f32 %v3063_v24, %v371_v44  ;;  %1059 = vst.msk [vmem:[#allocation2 + $0x1c0] sm:$0xff] %vm297_vm3, %v994_v34  ;;  %v1161_v27 = vmul.f32 %v2811_v45, %v1093_v19  ;;  %v3196_v44 = vld [vmem:[%s3629_s2] ss:$0 sm:$0xff] }
  0xf3   : > { %2288 = vpow2.f32 %v1376_v31  ;;  %v1442_v28 = vmul.f32 1.442695, %v1324_v52  ;;  %v1348_v30 = vmul.f32 1.442695, %v1277_v12  ;;  %v1177_v38 = vmul.f32 %v2811_v45, %v1109_v11 }
  0xf4   : > { %2290 = vpow2.f32 %v1408_v49  ;;  %1012 = vst.msk [vmem:[#allocation2 + $0x48] sm:$0xff] %vm297_vm3, %v947_v14  ;;  %v1125_v49 = vld [vmem:[#allocation2 + $0x1b8] sm:$0xff]  ;;  %v3180_v17 = vadd.f32 %v2820_v50, %v1161_v27  ;;  %v1146_v57 = vmul.f32 %v2811_v45, %v1078_v33  ;;  %v1162_v55 = vmul.f32 %v3196_v44, %v1094_v59 }
  0xf5   : > { %v2281_v58 = vpop.eup %2280  ;;  %2292 = vpow2.f32 %v1440_v51  ;;  %v3157_v13 = vpop.f32.mrf.mxu2  ;;  %v1193_v51 = vmul.f32 %v2811_v45, %v1125_v49  ;;  %v3186_v54 = vadd.f32 %v2820_v50, %v1177_v38 }
  0xf6   : > { %v3159_v61 = vpop.f32.mrf.mxu3  ;;  %v2283_v25 = vpop.eup %2282  ;;  %v1610_v47 = vmul.f32 %v2281_v58, %v2981_v43  ;;  %2294 = vpow2.f32 %v1346_v9  ;;  %v1293_v53 = vsub.f32 0.0, %v3180_v17  ;;  %v3204_v58 = vld [vmem:[%s3630_s3] ss:$0 sm:$0xff] }
  0xf7   : > { %v2285_v2 = vpop.eup %2284  ;;  %v1626_v6 = vmul.f32 %v2283_v25, %v3023_v42  ;;  %v3166_v16 = vpop.f32.mrf.mxu0  ;;  %2296 = vpow2.f32 %v1378_v3  ;;  %v963_v42 = vadd.f32 %v3065_v41, %v387_v32  ;;  %v3191_v4 = vadd.f32 %v2820_v50, %v1193_v51 }
  0xf8   : > { %v3168_v20 = vpop.f32.mrf.mxu1  ;;  %v2287_v43 = vpop.eup %2286  ;;  %v1674_v21 = vpack.c.bf16 %v1610_v47, %v1610_v47  ;;  %v1642_v7 = vmul.f32 %v2285_v2, %v3027_v62  ;;  %2298 = vpow2.f32 %v1410_v26  ;;  %v1309_v34 = vsub.f32 0.0, %v3186_v54  ;;  %v1110_v25 = vld [vmem:[#allocation2 + $0x140] sm:$0xff] }
  0xf9   : > { %v2289_v24 = vpop.eup %2288  ;;  %v1690_v18 = vpack.c.bf16 %v1626_v6, %v1626_v6  ;;  %v1467_v22 = vadd.f32 1.0, %v2287_v43  ;;  %2300 = vpow2.f32 %v1442_v28  ;;  %1028 = vst.msk [vmem:[#allocation2 + $0xc8] sm:$0xff] %vm297_vm3, %v963_v42  ;;  %v3207_v50 = vadd.f32 %v3204_v58, %v1146_v57  ;;  %v1126_v28 = vld [vmem:[#allocation2 + $0x1c0] sm:$0xff] }
  0xfa   : > { %v2291_v31 = vpop.eup %2290  ;;  %1739 = vst.msk [vmem:[%s2910_s30 + $0x50] sm:$0xf] %vm1718_vm4, %v1674_v21  ;;  %v1706_v36 = vpack.c.bf16 %v1642_v7, %v1642_v7  ;;  %v1483_v62 = vadd.f32 1.0, %v2289_v24  ;;  %v1380_v12 = vmul.f32 1.442695, %v1293_v53  ;;  %v1325_v32 = vsub.f32 0.0, %v3191_v4 }
  0xfb   : > { %v2293_v40 = vpop.eup %2292  ;;  %1755 = vst.msk [vmem:[%s2910_s30 + $0x90] sm:$0xf] %vm1718_vm4, %v1690_v18  ;;  %2302 = vrcp.f32 %v1467_v22  ;;  %v1499_v41 = vadd.f32 1.0, %v2291_v31  ;;  %v1412_v2 = vmul.f32 1.442695, %v1309_v34  ;;  %v1278_v6 = vsub.f32 0.0, %v3207_v50 }
  0xfc   : > { %1771 = vst.msk [vmem:[%s2910_s30 + $0xd0] sm:$0xf] %vm1718_vm4, %v1706_v36  ;;  %2304 = vrcp.f32 %v1483_v62  ;;  %v1515_v10 = vadd.f32 1.0, %v2293_v40  ;;  %v2295_v60 = vpop.eup %2294  ;;  %v1444_v7 = vmul.f32 1.442695, %v1325_v32  ;;  %v1178_v27 = vmul.f32 %v3196_v44, %v1110_v25 }
  0xfd   : > { %2306 = vrcp.f32 %v1499_v41  ;;  %v2297_v39 = vpop.eup %2296  ;;  %v1468_v45 = vadd.f32 1.0, %v2295_v60  ;;  %v3210_v47 = vpop.f32.mrf.mxu2  ;;  %v1350_v22 = vmul.f32 1.442695, %v1278_v6  ;;  %v1194_v62 = vmul.f32 %v3196_v44, %v1126_v28 }
  0xfe   : > { %2308 = vrcp.f32 %v1515_v10  ;;  %v2299_v9 = vpop.eup %2298  ;;  %v1484_v52 = vadd.f32 1.0, %v2297_v39  ;;  %v3212_v3 = vpop.f32.mrf.mxu3  ;;  %v1079_v10 = vld [vmem:[#allocation2 + $0x48] sm:$0xff] }
  0xff   : > { %2310 = vpow2.f32 %v1348_v30  ;;  %v2301_v26 = vpop.eup %2300  ;;  %v1500_v14 = vadd.f32 1.0, %v2299_v9  ;;  %v3216_v30 = vadd.f32 %v3204_v58, %v1162_v55  ;;  %v3218_v19 = vpop.f32.mrf.mxu0 }
 0x100   : > { %2312 = vrcp.f32 %v1468_v45  ;;  %v1516_v21 = vadd.f32 1.0, %v2301_v26  ;;  %v3220_v42 = vpop.f32.mrf.mxu1 }
 0x101   : > { %v2303_v43 = vpop.eup %2302  ;;  %2314 = vrcp.f32 %v1484_v52  ;;  %v1294_v36 = vsub.f32 0.0, %v3216_v30  ;;  %v1147_v52 = vmul.f32 %v3196_v44, %v1079_v10 }
 0x102   : > { %v2305_v24 = vpop.eup %2304  ;;  %v1595_v18 = vmul.f32 %v2303_v43, %v3078_v1  ;;  %2316 = vrcp.f32 %v1500_v14  ;;  %v3229_v1 = vadd.f32 %v3204_v58, %v1178_v27  ;;  %v403_v14 = vld [vmem:[#allocation2 + $0x148] sm:$0xff] }
 0x103   : > { %v2307_v11 = vpop.eup %2306  ;;  %v1611_v31 = vmul.f32 %v2305_v24, %v3085_v63  ;;  %2318 = vrcp.f32 %v1516_v21  ;;  %v1382_v63 = vmul.f32 1.442695, %v1294_v36  ;;  %v3255_v21 = vadd.f32 %v3204_v58, %v1147_v52  ;;  %v405_v52 = vld [vmem:[#allocation2 + $0x158] sm:$0xff] }
 0x104   : > { %v2309_v38 = vpop.eup %2308  ;;  %v1659_v49 = vpack.c.bf16 %v1595_v18, %v1595_v18  ;;  %v1627_v40 = vmul.f32 %v2307_v11, %v3093_v5  ;;  %2320 = vpow2.f32 %v1380_v12  ;;  %v1310_v5 = vsub.f32 0.0, %v3229_v1  ;;  %v1095_v12 = vld [vmem:[#allocation2 + $0xc8] sm:$0xff] }
 0x105   : > { %v2311_v41 = vpop.eup %2310  ;;  %v1675_v51 = vpack.c.bf16 %v1611_v31, %v1611_v31  ;;  %v1643_v33 = vmul.f32 %v2309_v38, %v3100_v15  ;;  %2322 = vpow2.f32 %v1412_v2  ;;  %v3239_v15 = vadd.f32 %v3204_v58, %v1194_v62  ;;  %v3249_v2 = vpop.f32.mrf.mxu2  ;;  %v372_v31 = vld [vmem:[#allocation2 + $0x50] sm:$0xff] }
 0x106   : > { %v2313_v57 = vpop.eup %2312  ;;  %1724 = vst.msk [vmem:[%s2910_s30 + $0x14] sm:$0xf] %vm1718_vm4, %v1659_v49  ;;  %v1691_v59 = vpack.c.bf16 %v1627_v40, %v1627_v40  ;;  %v1469_v60 = vadd.f32 1.0, %v2311_v41  ;;  %2324 = vpow2.f32 %v1444_v7  ;;  %v1414_v9 = vmul.f32 1.442695, %v1310_v5  ;;  %v3251_v6 = vpop.f32.mrf.mxu3  ;;  %v419_v7 = vld [vmem:[#allocation2 + $0x1c8] sm:$0xff] }
 0x107   : > { %v2315_v53 = vpop.eup %2314  ;;  %1740 = vst.msk [vmem:[%s2910_s30 + $0x54] sm:$0xf] %vm1718_vm4, %v1675_v51  ;;  %v1707_v55 = vpack.c.bf16 %v1643_v33, %v1643_v33  ;;  %v1596_v39 = vmul.f32 %v2313_v57, %v3124_v56  ;;  %2326 = vpow2.f32 %v1350_v22  ;;  %v1326_v26 = vsub.f32 0.0, %v3239_v15  ;;  %v3257_v24 = vpop.f32.mrf.mxu0  ;;  %v388_v41 = vld [vmem:[#allocation2 + $0xd0] sm:$0xff] }
 0x108   : > { %v2317_v45 = vpop.eup %2316  ;;  %1756 = vst.msk [vmem:[%s2910_s30 + $0x94] sm:$0xf] %vm1718_vm4, %v1691_v59  ;;  %v1612_v34 = vmul.f32 %v2315_v53, %v3131_v37  ;;  %2328 = vrcp.f32 %v1469_v60  ;;  %v1163_v11 = vmul.f32 %v3196_v44, %v1095_v12  ;;  %v3262_v36 = vpop.f32.mrf.mxu1  ;;  %v1279_v49 = vsub.f32 0.0, %v3255_v21  ;;  %v404_v57 = vld [vmem:[#allocation2 + $0x150] sm:$0xff] }
 0x109   : > { %v2319_v32 = vpop.eup %2318  ;;  %1772 = vst.msk [vmem:[%s2910_s30 + $0xd4] sm:$0xf] %vm1718_vm4, %v1707_v55  ;;  %v1660_v25 = vpack.c.bf16 %v1596_v39, %v1596_v39  ;;  %v1628_v56 = vmul.f32 %v2317_v45, %v3134_v0  ;;  %2330 = vpow2.f32 %v1382_v63  ;;  %v1446_v27 = vmul.f32 1.442695, %v1326_v26  ;;  %v420_v59 = vld [vmem:[#allocation2 + $0x1d0] sm:$0xff]  ;;  %v390_v26 = vld [vmem:[#allocation2 + $0xe0] sm:$0xff] }
 0x10a   : > { %v2321_v37 = vpop.eup %2320  ;;  %v1676_v28 = vpack.c.bf16 %v1612_v34, %v1612_v34  ;;  %v1644_v43 = vmul.f32 %v2319_v32, %v3141_v8  ;;  %2332 = vpow2.f32 %v1414_v9  ;;  %v979_v40 = vadd.f32 %v3105_v35, %v403_v14  ;;  %v373_v34 = vld [vmem:[#allocation2 + $0x58] sm:$0xff] }
 0x10b   : > { %v2323_v0 = vpop.eup %2322  ;;  %1725 = vst.msk [vmem:[%s2910_s30 + $0x18] sm:$0xf] %vm1718_vm4, %v1660_v25  ;;  %v1692_v18 = vpack.c.bf16 %v1628_v56, %v1628_v56  ;;  %v1485_v22 = vadd.f32 1.0, %v2321_v37  ;;  %v3271_v63 = vadd.f32 %v3204_v58, %v1163_v11  ;;  %v995_v10 = vadd.f32 %v3107_v23, %v419_v7  ;;  %v389_v9 = vld [vmem:[#allocation2 + $0xd8] sm:$0xff]  ;;  %v374_v56 = vld [vmem:[#allocation2 + $0x60] sm:$0xff] }
 0x10c   : > { %v2325_v8 = vpop.eup %2324  ;;  %1741 = vst.msk [vmem:[%s2910_s30 + $0x58] sm:$0xf] %vm1718_vm4, %v1676_v28  ;;  %v1708_v62 = vpack.c.bf16 %v1644_v43, %v1644_v43  ;;  %v1501_v38 = vadd.f32 1.0, %v2323_v0  ;;  %v1352_v53 = vmul.f32 1.442695, %v1279_v49  ;;  %v948_v35 = vadd.f32 %v3115_v46, %v372_v31  ;;  %v406_v28 = vld [vmem:[#allocation2 + $0x160] sm:$0xff] }
 0x10d   : > { %v2327_v51 = vpop.eup %2326  ;;  %1757 = vst.msk [vmem:[%s2910_s30 + $0x98] sm:$0xf] %vm1718_vm4, %v1692_v18  ;;  %2334 = vrcp.f32 %v1485_v22  ;;  %v1517_v33 = vadd.f32 1.0, %v2325_v8  ;;  %v1295_v45 = vsub.f32 0.0, %v3271_v63  ;;  %v964_v23 = vadd.f32 %v3117_v48, %v388_v41  ;;  %v422_v43 = vld [vmem:[#allocation2 + $0x1e0] sm:$0xff]  ;;  %v375_v0 = vld [vmem:[#allocation2 + $0x68] sm:$0xff] }
 0x10e   : > { %v2329_v60 = vpop.eup %2328  ;;  %1773 = vst.msk [vmem:[%s2910_s30 + $0xd8] sm:$0xf] %vm1718_vm4, %v1708_v62  ;;  %2336 = vrcp.f32 %v1501_v38  ;;  %v1470_v5 = vadd.f32 1.0, %v2327_v51  ;;  %v980_v46 = vadd.f32 %v3157_v13, %v404_v57  ;;  %v996_v25 = vadd.f32 %v3159_v61, %v420_v59  ;;  %v391_v18 = vld [vmem:[#allocation2 + $0xe8] sm:$0xff] }
 0x10f   : > { %v2331_v55 = vpop.eup %2330  ;;  %v1597_v39 = vmul.f32 %v2329_v60, %v3144_v29  ;;  %2338 = vrcp.f32 %v1517_v33  ;;  %1044 = vst.msk [vmem:[#allocation2 + $0x148] sm:$0xff] %vm297_vm3, %v979_v40  ;;  %v421_v29 = vld [vmem:[#allocation2 + $0x1d8] sm:$0xff]  ;;  %v1384_v48 = vmul.f32 1.442695, %v1295_v45  ;;  %v949_v7 = vadd.f32 %v3166_v16, %v373_v34  ;;  %v407_v16 = vld [vmem:[#allocation2 + $0x168] sm:$0xff]  ;;  %v813_v40 = vpop.f32.mrf.mxu0  ;;  %v392_v33 = vld [vmem:[#allocation2 + $0xf0] sm:$0xff] }
 0x110   : > { %v2333_v12 = vpop.eup %2332  ;;  %2340 = vrcp.f32 %v1470_v5  ;;  %v1486_v32 = vadd.f32 1.0, %v2331_v55  ;;  %1060 = vst.msk [vmem:[#allocation2 + $0x1c8] sm:$0xff] %vm297_vm3, %v995_v10  ;;  %v965_v13 = vadd.f32 %v3168_v20, %v389_v9  ;;  %v3289_v61 = vadd.f32 %v3210_v47, %v405_v52  ;;  %v890_v20 = vpop.f32.mrf.mxu2  ;;  %v423_v8 = vld [vmem:[#allocation2 + $0x1e8] sm:$0xff] }
 0x111   : > { %v1661_v14 = vpack.c.bf16 %v1597_v39, %v1597_v39  ;;  %v1502_v37 = vadd.f32 1.0, %v2333_v12  ;;  %2342 = vpow2.f32 %v1446_v27  ;;  %1013 = vst.msk [vmem:[#allocation2 + $0x50] sm:$0xff] %vm297_vm3, %v948_v35  ;;  %v3294_v27 = vadd.f32 %v3212_v3, %v421_v29  ;;  %v930_v47 = vpop.f32.mrf.mxu3 }
 0x112   : > { %2344 = vrcp.f32 %v1486_v32  ;;  %1029 = vst.msk [vmem:[#allocation2 + $0xd0] sm:$0xff] %vm297_vm3, %v964_v23  ;;  %v3297_v11 = vadd.f32 %v3218_v19, %v374_v56  ;;  %v3300_v31 = vadd.f32 %v3220_v42, %v390_v26  ;;  %v3305_v49 = vadd.f32 %v3249_v2, %v406_v28  ;;  %v376_v19 = vld [vmem:[#allocation2 + $0x70] sm:$0xff]  ;;  %v853_v2 = vpop.f32.mrf.mxu1 }
 0x113   : > { %v2335_v22 = vpop.eup %2334  ;;  %1726 = vst.msk [vmem:[%s2910_s30 + $0x1c] sm:$0xf] %vm1718_vm4, %v1661_v14  ;;  %2346 = vrcp.f32 %v1502_v37  ;;  %v3308_v3 = vadd.f32 %v3251_v6, %v422_v43  ;;  %v3313_v51 = vadd.f32 %v3257_v24, %v375_v0  ;;  %v3322_v60 = vadd.f32 %v930_v47, %v423_v8 }
 0x114   : > { %v2337_v62 = vpop.eup %2336  ;;  %v1613_v38 = vmul.f32 %v2335_v22, %v3180_v17  ;;  %2348 = vpow2.f32 %v1352_v53  ;;  %1045 = vst.msk [vmem:[#allocation2 + $0x150] sm:$0xff] %vm297_vm3, %v980_v46  ;;  %v3316_v17 = vadd.f32 %v3262_v36, %v391_v18  ;;  %v3327_v55 = vadd.f32 %v813_v40, %v376_v19 }
 0x115   : > { %v2339_v42 = vpop.eup %2338  ;;  %v1629_v41 = vmul.f32 %v2337_v62, %v3186_v54  ;;  %2350 = vpow2.f32 %v1384_v48  ;;  %1061 = vst.msk [vmem:[#allocation2 + $0x1d0] sm:$0xff] %vm297_vm3, %v996_v25  ;;  %v3320_v54 = vadd.f32 %v890_v20, %v407_v16  ;;  %v3332_v9 = vadd.f32 %v853_v2, %v392_v33  ;;  %v408_v33 = vld [vmem:[#allocation2 + $0x170] sm:$0xff] }
 0x116   : > { %v2341_v10 = vpop.eup %2340  ;;  %v1677_v6 = vpack.c.bf16 %v1613_v38, %v1613_v38  ;;  %v1645_v57 = vmul.f32 %v2339_v42, %v3191_v4  ;;  %v1111_v59 = vld [vmem:[#allocation2 + $0x148] sm:$0xff]  ;;  %1014 = vst.msk [vmem:[#allocation2 + $0x58] sm:$0xff] %vm297_vm3, %v949_v7 }
 0x117   : > { %v2343_v24 = vpop.eup %2342  ;;  %v1693_v5 = vpack.c.bf16 %v1629_v41, %v1629_v41  ;;  %v1598_v36 = vmul.f32 %v2341_v10, %v3207_v50  ;;  %v1179_v53 = vmul.f32 %v3196_v44, %v1111_v59  ;;  %v1127_v35 = vld [vmem:[#allocation2 + $0x1c8] sm:$0xff]  ;;  %1030 = vst.msk [vmem:[#allocation2 + $0xd8] sm:$0xff] %vm297_vm3, %v965_v13 }
 0x118   : > { %v2345_v4 = vpop.eup %2344  ;;  %1742 = vst.msk [vmem:[%s2910_s30 + $0x5c] sm:$0xf] %vm1718_vm4, %v1677_v6  ;;  %v1709_v39 = vpack.c.bf16 %v1645_v57, %v1645_v57  ;;  %v1518_v45 = vadd.f32 1.0, %v2343_v24  ;;  %v1195_v23 = vmul.f32 %v3196_v44, %v1127_v35  ;;  %v1080_v34 = vld [vmem:[#allocation2 + $0x50] sm:$0xff]  ;;  %v893_v2 = vpop.f32.mrf.mxu2 }
 0x119   : > { %v2347_v50 = vpop.eup %2346  ;;  %1758 = vst.msk [vmem:[%s2910_s30 + $0x9c] sm:$0xf] %vm1718_vm4, %v1693_v5  ;;  %v1662_v52 = vpack.c.bf16 %v1598_v36, %v1598_v36  ;;  %v1614_v12 = vmul.f32 %v2345_v4, %v3216_v30  ;;  %v3338_v32 = vadd.f32 %v3204_v58, %v1179_v53  ;;  %v1148_v46 = vmul.f32 %v3196_v44, %v1080_v34  ;;  %v1096_v25 = vld [vmem:[#allocation2 + $0xd0] sm:$0xff]  ;;  %v933_v5 = vpop.f32.mrf.mxu3 }
 0x11a   : > { %v2349_v29 = vpop.eup %2348  ;;  %1774 = vst.msk [vmem:[%s2910_s30 + $0xdc] sm:$0xf] %vm1718_vm4, %v1709_v39  ;;  %v1630_v56 = vmul.f32 %v2347_v50, %v3229_v1  ;;  %2352 = vrcp.f32 %v1518_v45  ;;  %v3345_v26 = vadd.f32 %v3204_v58, %v1195_v23  ;;  %v1164_v14 = vmul.f32 %v3196_v44, %v1096_v25  ;;  %v424_v24 = vld [vmem:[#allocation2 + $0x1f0] sm:$0xff]  ;;  %v815_v39 = vpop.f32.mrf.mxu0 }
 0x11b   : > { %v2351_v37 = vpop.eup %2350  ;;  %1727 = vst.msk [vmem:[%s2910_s30 + $0x20] sm:$0xf] %vm1718_vm4, %v1662_v52  ;;  %v1678_v30 = vpack.c.bf16 %v1614_v12, %v1614_v12  ;;  %v1471_v48 = vadd.f32 1.0, %v2349_v29  ;;  %v1311_v28 = vsub.f32 0.0, %v3338_v32  ;;  %v3352_v43 = vadd.f32 %v3204_v58, %v1148_v46  ;;  %v1112_v7 = vld [vmem:[#allocation2 + $0x150] sm:$0xff] }
 0x11c   : > { %v1694_v1 = vpack.c.bf16 %v1630_v56, %v1630_v56  ;;  %v1487_v13 = vadd.f32 1.0, %v2351_v37  ;;  %v1327_v0 = vsub.f32 0.0, %v3345_v26  ;;  %v3356_v18 = vadd.f32 %v3204_v58, %v1164_v14  ;;  %v1128_v22 = vld [vmem:[#allocation2 + $0x1d0] sm:$0xff]  ;;  %1046 = vst.msk [vmem:[#allocation2 + $0x158] sm:$0xff] %vm297_vm3, %v3289_v61 }
 0x11d   : > { %1743 = vst.msk [vmem:[%s2910_s30 + $0x60] sm:$0xf] %vm1718_vm4, %v1678_v30  ;;  %2354 = vrcp.f32 %v1471_v48  ;;  %v1416_v16 = vmul.f32 1.442695, %v1311_v28  ;;  %v1280_v20 = vsub.f32 0.0, %v3352_v43  ;;  %v1180_v8 = vmul.f32 %v3196_v44, %v1112_v7  ;;  %v1081_v47 = vld [vmem:[#allocation2 + $0x58] sm:$0xff] }
 0x11e   : > { %1759 = vst.msk [vmem:[%s2910_s30 + $0xa0] sm:$0xf] %vm1718_vm4, %v1694_v1  ;;  %2356 = vrcp.f32 %v1487_v13  ;;  %v1448_v62 = vmul.f32 1.442695, %v1327_v0  ;;  %v1296_v38 = vsub.f32 0.0, %v3356_v18  ;;  %v1196_v19 = vmul.f32 %v3196_v44, %v1128_v22  ;;  %v1097_v40 = vld [vmem:[#allocation2 + $0xd8] sm:$0xff] }
 0x11f   : > { %2358 = vpow2.f32 %v1416_v16  ;;  %v1354_v61 = vmul.f32 1.442695, %v1280_v20  ;;  %v3369_v42 = vadd.f32 %v3204_v58, %v1180_v8  ;;  %v1149_v41 = vmul.f32 %v3196_v44, %v1081_v47  ;;  %1062 = vst.msk [vmem:[#allocation2 + $0x1d8] sm:$0xff] %vm297_vm3, %v3294_v27 }
 0x120   : > { %v2353_v10 = vpop.eup %2352  ;;  %2360 = vpow2.f32 %v1448_v62  ;;  %v1386_v6 = vmul.f32 1.442695, %v1296_v38  ;;  %v3375_v57 = vadd.f32 %v3204_v58, %v1196_v19  ;;  %v1165_v59 = vmul.f32 %v3196_v44, %v1097_v40  ;;  %1015 = vst.msk [vmem:[#allocation2 + $0x60] sm:$0xff] %vm297_vm3, %v3297_v11 }
 0x121   : > { %v1646_v36 = vmul.f32 %v2353_v10, %v3239_v15  ;;  %2362 = vpow2.f32 %v1354_v61  ;;  %v1312_v27 = vsub.f32 0.0, %v3369_v42  ;;  %v3383_v53 = vadd.f32 %v3204_v58, %v1149_v41  ;;  %1031 = vst.msk [vmem:[#allocation2 + $0xe0] sm:$0xff] %vm297_vm3, %v3300_v31  ;;  %v377_v15 = vld [vmem:[#allocation2 + $0x78] sm:$0xff] }
 0x122   : > { %2364 = vpow2.f32 %v1386_v6  ;;  %v1328_v35 = vsub.f32 0.0, %v3375_v57  ;;  %v3389_v4 = vadd.f32 %v3204_v58, %v1165_v59  ;;  %1047 = vst.msk [vmem:[#allocation2 + $0x160] sm:$0xff] %vm297_vm3, %v3305_v49  ;;  %v3393_v11 = vadd.f32 %v893_v2, %v408_v33 }
 0x123   : > { %v2355_v45 = vpop.eup %2354  ;;  %v1710_v23 = vpack.c.bf16 %v1646_v36, %v1646_v36  ;;  %v1418_v34 = vmul.f32 1.442695, %v1312_v27  ;;  %v1281_v50 = vsub.f32 0.0, %v3383_v53  ;;  %v1113_v31 = vld [vmem:[#allocation2 + $0x158] sm:$0xff]  ;;  %1063 = vst.msk [vmem:[#allocation2 + $0x1e0] sm:$0xff] %vm297_vm3, %v3308_v3  ;;  %v3398_v52 = vadd.f32 %v933_v5, %v424_v24 }
 0x124   : > { %v2357_v12 = vpop.eup %2356  ;;  %v1599_v46 = vmul.f32 %v2355_v45, %v3255_v21  ;;  %v1450_v49 = vmul.f32 1.442695, %v1328_v35  ;;  %v1297_v25 = vsub.f32 0.0, %v3389_v4  ;;  %v1181_v29 = vmul.f32 %v3196_v44, %v1113_v31  ;;  %1016 = vst.msk [vmem:[#allocation2 + $0x68] sm:$0xff] %vm297_vm3, %v3313_v51 }
 0x125   : > { %v2359_v56 = vpop.eup %2358  ;;  %1775 = vst.msk [vmem:[%s2910_s30 + $0xe0] sm:$0xf] %vm1718_vm4, %v1710_v23  ;;  %v1615_v14 = vmul.f32 %v2357_v12, %v3271_v63  ;;  %2366 = vpow2.f32 %v1418_v34  ;;  %v1356_v3 = vmul.f32 1.442695, %v1281_v50  ;;  %v3408_v37 = vadd.f32 %v815_v39, %v377_v15 }
 0x126   : > { %v2361_v30 = vpop.eup %2360  ;;  %v1663_v21 = vpack.c.bf16 %v1599_v46, %v1599_v46  ;;  %v1503_v48 = vadd.f32 1.0, %v2359_v56  ;;  %2368 = vpow2.f32 %v1450_v49  ;;  %v1388_v28 = vmul.f32 1.442695, %v1297_v25  ;;  %v1129_v7 = vld [vmem:[#allocation2 + $0x1d8] sm:$0xff]  ;;  %1032 = vst.msk [vmem:[#allocation2 + $0xe8] sm:$0xff] %vm297_vm3, %v3316_v17 }
 0x127   : > { %v2363_v51 = vpop.eup %2362  ;;  %v1679_v1 = vpack.c.bf16 %v1615_v14, %v1615_v14  ;;  %v1519_v13 = vadd.f32 1.0, %v2361_v30  ;;  %2370 = vpow2.f32 %v1356_v3  ;;  %v3413_v63 = vadd.f32 %v3204_v58, %v1181_v29  ;;  %v1082_v0 = vld [vmem:[#allocation2 + $0x60] sm:$0xff]  ;;  %1048 = vst.msk [vmem:[#allocation2 + $0x168] sm:$0xff] %vm297_vm3, %v3320_v54 }
 0x128   : > { %v2365_v22 = vpop.eup %2364  ;;  %1728 = vst.msk [vmem:[%s2910_s30 + $0x24] sm:$0xf] %vm1718_vm4, %v1663_v21  ;;  %2372 = vrcp.f32 %v1503_v48  ;;  %v1472_v16 = vadd.f32 1.0, %v2363_v51  ;;  %v1197_v20 = vmul.f32 %v3196_v44, %v1129_v7  ;;  %v1150_v17 = vmul.f32 %v3196_v44, %v1082_v0  ;;  %v1098_v8 = vld [vmem:[#allocation2 + $0xe0] sm:$0xff] }
 0x129   : > { %1744 = vst.msk [vmem:[%s2910_s30 + $0x64] sm:$0xf] %vm1718_vm4, %v1679_v1  ;;  %2374 = vrcp.f32 %v1519_v13  ;;  %v1488_v47 = vadd.f32 1.0, %v2365_v22  ;;  %v1313_v62 = vsub.f32 0.0, %v3413_v63  ;;  %v1166_v38 = vmul.f32 %v3196_v44, %v1098_v8  ;;  %v1114_v19 = vld [vmem:[#allocation2 + $0x160] sm:$0xff] }
 0x12a   : > { %2376 = vrcp.f32 %v1472_v16  ;;  %v3426_v54 = vadd.f32 %v3204_v58, %v1197_v20  ;;  %v3429_v40 = vadd.f32 %v3204_v58, %v1150_v17  ;;  %v1182_v61 = vmul.f32 %v3196_v44, %v1114_v19  ;;  %v1130_v41 = vld [vmem:[#allocation2 + $0x1e0] sm:$0xff]  ;;  %1064 = vst.msk [vmem:[#allocation2 + $0x1e8] sm:$0xff] %vm297_vm3, %v3322_v60 }
 0x12b   : > { %v2367_v33 = vpop.eup %2366  ;;  %2378 = vrcp.f32 %v1488_v47  ;;  %v1420_v2 = vmul.f32 1.442695, %v1313_v62  ;;  %v3435_v10 = vadd.f32 %v3204_v58, %v1166_v38  ;;  %v1198_v6 = vmul.f32 %v3196_v44, %v1130_v41  ;;  %1017 = vst.msk [vmem:[#allocation2 + $0x70] sm:$0xff] %vm297_vm3, %v3327_v55  ;;  %v1083_v39 = vld [vmem:[#allocation2 + $0x68] sm:$0xff] }
 0x12c   : > { %v2369_v59 = vpop.eup %2368  ;;  %v1504_v24 = vadd.f32 1.0, %v2367_v33  ;;  %2380 = vpow2.f32 %v1388_v28  ;;  %v1329_v5 = vsub.f32 0.0, %v3426_v54  ;;  %v1282_v36 = vsub.f32 0.0, %v3429_v40  ;;  %1033 = vst.msk [vmem:[#allocation2 + $0xf0] sm:$0xff] %vm297_vm3, %v3332_v9 }
 0x12d   : > { %v2371_v60 = vpop.eup %2370  ;;  %v1520_v27 = vadd.f32 1.0, %v2369_v59  ;;  %2382 = vpow2.f32 %v1420_v2  ;;  %v1298_v35 = vsub.f32 0.0, %v3435_v10  ;;  %v3446_v15 = vadd.f32 %v3204_v58, %v1182_v61  ;;  %1049 = vst.msk [vmem:[#allocation2 + $0x170] sm:$0xff] %vm297_vm3, %v3393_v11  ;;  %v1099_v21 = vld [vmem:[#allocation2 + $0xe8] sm:$0xff] }
 0x12e   : > { %v2373_v55 = vpop.eup %2372  ;;  %2384 = vrcp.f32 %v1504_v24  ;;  %v1473_v45 = vadd.f32 1.0, %v2371_v60  ;;  %v1452_v23 = vmul.f32 1.442695, %v1329_v5  ;;  %v1358_v34 = vmul.f32 1.442695, %v1282_v36  ;;  %1065 = vst.msk [vmem:[#allocation2 + $0x1f0] sm:$0xff] %vm297_vm3, %v3398_v52 }
 0x12f   : > { %v2375_v50 = vpop.eup %2374  ;;  %v1631_v9 = vmul.f32 %v2373_v55, %v3338_v32  ;;  %2386 = vrcp.f32 %v1520_v27  ;;  %v1390_v31 = vmul.f32 1.442695, %v1298_v35  ;;  %v1314_v12 = vsub.f32 0.0, %v3446_v15  ;;  %1018 = vst.msk [vmem:[#allocation2 + $0x78] sm:$0xff] %vm297_vm3, %v3408_v37  ;;  %v1115_v7 = vld [vmem:[#allocation2 + $0x168] sm:$0xff] }
 0x130   : > { %v2377_v46 = vpop.eup %2376  ;;  %v1647_v49 = vmul.f32 %v2375_v50, %v3345_v26  ;;  %2388 = vrcp.f32 %v1473_v45  ;;  %v3456_v11 = vadd.f32 %v3204_v58, %v1198_v6  ;;  %v1151_v25 = vmul.f32 %v3196_v44, %v1083_v39 }
 0x131   : > { %v2379_v32 = vpop.eup %2378  ;;  %v1695_v29 = vpack.c.bf16 %v1631_v9, %v1631_v9  ;;  %v1600_v56 = vmul.f32 %v2377_v46, %v3352_v43  ;;  %2390 = vpow2.f32 %v1452_v23  ;;  %v1422_v14 = vmul.f32 1.442695, %v1314_v12  ;;  %v1131_v51 = vld [vmem:[#allocation2 + $0x1e8] sm:$0xff] }
 0x132   : > { %v2381_v52 = vpop.eup %2380  ;;  %v1711_v3 = vpack.c.bf16 %v1647_v49, %v1647_v49  ;;  %v1616_v26 = vmul.f32 %v2379_v32, %v3356_v18  ;;  %2392 = vpow2.f32 %v1358_v34  ;;  %v1330_v30 = vsub.f32 0.0, %v3456_v11  ;;  %v1084_v24 = vld [vmem:[#allocation2 + $0x70] sm:$0xff] }
 0x133   : > { %v2383_v48 = vpop.eup %2382  ;;  %1760 = vst.msk [vmem:[%s2910_s30 + $0xa4] sm:$0xf] %vm1718_vm4, %v1695_v29  ;;  %v1664_v37 = vpack.c.bf16 %v1600_v56, %v1600_v56  ;;  %v1489_v28 = vadd.f32 1.0, %v2381_v52  ;;  %2394 = vpow2.f32 %v1390_v31  ;;  %v3467_v43 = vadd.f32 %v3204_v58, %v1151_v25  ;;  %v1100_v9 = vld [vmem:[#allocation2 + $0xf0] sm:$0xff] }
 0x134   : > { %v2385_v1 = vpop.eup %2384  ;;  %1776 = vst.msk [vmem:[%s2910_s30 + $0xe4] sm:$0xf] %vm1718_vm4, %v1711_v3  ;;  %v1680_v18 = vpack.c.bf16 %v1616_v26, %v1616_v26  ;;  %v1505_v13 = vadd.f32 1.0, %v2383_v48  ;;  %2396 = vpow2.f32 %v1422_v14  ;;  %v1454_v0 = vmul.f32 1.442695, %v1330_v30  ;;  %v1116_v25 = vld [vmem:[#allocation2 + $0x170] sm:$0xff] }
 0x135   : > { %v2387_v22 = vpop.eup %2386  ;;  %1729 = vst.msk [vmem:[%s2910_s30 + $0x28] sm:$0xf] %vm1718_vm4, %v1664_v37  ;;  %v1632_v16 = vmul.f32 %v2385_v1, %v3369_v42  ;;  %2398 = vrcp.f32 %v1489_v28  ;;  %v1283_v20 = vsub.f32 0.0, %v3467_v43  ;;  %v1167_v17 = vmul.f32 %v3196_v44, %v1099_v21  ;;  %v1132_v52 = vld [vmem:[#allocation2 + $0x1f0] sm:$0xff] }
 0x136   : > { %v2389_v8 = vpop.eup %2388  ;;  %1745 = vst.msk [vmem:[%s2910_s30 + $0x68] sm:$0xf] %vm1718_vm4, %v1680_v18  ;;  %v1648_v47 = vmul.f32 %v2387_v22, %v3375_v57  ;;  %2400 = vrcp.f32 %v1505_v13  ;;  %v1183_v62 = vmul.f32 %v3196_v44, %v1115_v7  ;;  %v1199_v38 = vmul.f32 %v3196_v44, %v1131_v51 }
 0x137   : > { %v2391_v19 = vpop.eup %2390  ;;  %v1696_v61 = vpack.c.bf16 %v1632_v16, %v1632_v16  ;;  %v1601_v42 = vmul.f32 %v2389_v8, %v3383_v53  ;;  %2402 = vpow2.f32 %v1454_v0  ;;  %v1360_v41 = vmul.f32 1.442695, %v1283_v20  ;;  %v1085_v8 = vld [vmem:[#allocation2 + $0x78] sm:$0xff] }
 0x138   : > { %v2393_v33 = vpop.eup %2392  ;;  %v1712_v2 = vpack.c.bf16 %v1648_v47, %v1648_v47  ;;  %v1521_v6 = vadd.f32 1.0, %v2391_v19  ;;  %v3483_v59 = vadd.f32 %v3204_v58, %v1167_v17  ;;  %v3486_v57 = vadd.f32 %v3204_v58, %v1183_v62 }
 0x139   : > { %v2395_v5 = vpop.eup %2394  ;;  %1761 = vst.msk [vmem:[%s2910_s30 + $0xa8] sm:$0xf] %vm1718_vm4, %v1696_v61  ;;  %v1665_v36 = vpack.c.bf16 %v1601_v42, %v1601_v42  ;;  %v1474_v60 = vadd.f32 1.0, %v2393_v33  ;;  %2404 = vpow2.f32 %v1360_v41  ;;  %v3491_v53 = vadd.f32 %v3204_v58, %v1199_v38  ;;  %v393_v33 = vld [vmem:[#allocation2 + $0xf8] sm:$0xff] }
 0x13a   : > { %v2397_v27 = vpop.eup %2396  ;;  %1777 = vst.msk [vmem:[%s2910_s30 + $0xe8] sm:$0xf] %vm1718_vm4, %v1712_v2  ;;  %2406 = vrcp.f32 %v1521_v6  ;;  %v1490_v35 = vadd.f32 1.0, %v2395_v5  ;;  %v1299_v39 = vsub.f32 0.0, %v3483_v59  ;;  %v1315_v55 = vsub.f32 0.0, %v3486_v57  ;;  %v855_v2 = vpop.f32.mrf.mxu1  ;;  %v409_v6 = vld [vmem:[#allocation2 + $0x178] sm:$0xff] }
 0x13b   : > { %v2399_v45 = vpop.eup %2398  ;;  %1730 = vst.msk [vmem:[%s2910_s30 + $0x2c] sm:$0xf] %vm1718_vm4, %v1665_v36  ;;  %2408 = vrcp.f32 %v1474_v60  ;;  %v1506_v23 = vadd.f32 1.0, %v2397_v27  ;;  %v1331_v34 = vsub.f32 0.0, %v3491_v53  ;;  %v1152_v50 = vmul.f32 %v3196_v44, %v1084_v24  ;;  %v895_v27 = vpop.f32.mrf.mxu2 }
 0x13c   : > { %v2401_v31 = vpop.eup %2400  ;;  %v1617_v12 = vmul.f32 %v2399_v45, %v3389_v4  ;;  %2410 = vrcp.f32 %v1490_v35  ;;  %v1392_v46 = vmul.f32 1.442695, %v1299_v39  ;;  %v1424_v49 = vmul.f32 1.442695, %v1315_v55  ;;  %v425_v35 = vld [vmem:[#allocation2 + $0x1f8] sm:$0xff] }
 0x13d   : > { %v2403_v32 = vpop.eup %2402  ;;  %v1633_v29 = vmul.f32 %v2401_v31, %v3413_v63  ;;  %2412 = vrcp.f32 %v1506_v23  ;;  %v1456_v56 = vmul.f32 1.442695, %v1331_v34  ;;  %v3504_v14 = vadd.f32 %v3204_v58, %v1152_v50 }
 0x13e   : > { %v1681_v3 = vpack.c.bf16 %v1617_v12, %v1617_v12  ;;  %v1522_v26 = vadd.f32 1.0, %v2403_v32  ;;  %2414 = vpow2.f32 %v1392_v46  ;;  %v1168_v4 = vmul.f32 %v3196_v44, %v1100_v9 }
 0x13f   : > { %v2405_v30 = vpop.eup %2404  ;;  %v1697_v21 = vpack.c.bf16 %v1633_v29, %v1633_v29  ;;  %2416 = vpow2.f32 %v1424_v49  ;;  %v1284_v48 = vsub.f32 0.0, %v3504_v14  ;;  %v1184_v37 = vmul.f32 %v3196_v44, %v1116_v25 }
 0x140   : > { %v2407_v63 = vpop.eup %2406  ;;  %1746 = vst.msk [vmem:[%s2910_s30 + $0x6c] sm:$0xf] %vm1718_vm4, %v1681_v3  ;;  %2418 = vrcp.f32 %v1522_v26  ;;  %v1475_v28 = vadd.f32 1.0, %v2405_v30  ;;  %v3512_v7 = vadd.f32 %v3204_v58, %v1168_v4  ;;  %v1200_v51 = vmul.f32 %v3196_v44, %v1132_v52 }
 0x141   : > { %v2409_v1 = vpop.eup %2408  ;;  %1762 = vst.msk [vmem:[%s2910_s30 + $0xac] sm:$0xf] %vm1718_vm4, %v1697_v21  ;;  %v1649_v18 = vmul.f32 %v2407_v63, %v3426_v54  ;;  %2420 = vpow2.f32 %v1456_v56  ;;  %v1362_v13 = vmul.f32 1.442695, %v1284_v48  ;;  %v3519_v0 = vadd.f32 %v3204_v58, %v1184_v37 }
 0x142   : > { %v2411_v22 = vpop.eup %2410  ;;  %v1602_v16 = vmul.f32 %v2409_v1, %v3429_v40  ;;  %2422 = vrcp.f32 %v1475_v28  ;;  %v1300_v20 = vsub.f32 0.0, %v3512_v7  ;;  %v3524_v17 = vadd.f32 %v3204_v58, %v1200_v51 }
 0x143   : > { %v2413_v47 = vpop.eup %2412  ;;  %v1713_v62 = vpack.c.bf16 %v1649_v18, %v1649_v18  ;;  %v1618_v54 = vmul.f32 %v2411_v22, %v3435_v10  ;;  %2424 = vpow2.f32 %v1362_v13  ;;  %v1316_v38 = vsub.f32 0.0, %v3519_v0  ;;  %v2464_v22 = vld [vmem:[%s3629_s2] ss:$0 sm:$0xff] }
 0x144   : > { %v2415_v19 = vpop.eup %2414  ;;  %v1666_v61 = vpack.c.bf16 %v1602_v16, %v1602_v16  ;;  %v1634_v42 = vmul.f32 %v2413_v47, %v3446_v15  ;;  %v1394_v40 = vmul.f32 1.442695, %v1300_v20  ;;  %v1332_v41 = vsub.f32 0.0, %v3524_v17  ;;  %v935_v15 = vpop.f32.mrf.mxu3 }
 0x145   : > { %v2417_v24 = vpop.eup %2416  ;;  %1778 = vst.msk [vmem:[%s2910_s30 + $0xec] sm:$0xf] %vm1718_vm4, %v1713_v62  ;;  %v1682_v5 = vpack.c.bf16 %v1618_v54, %v1618_v54  ;;  %v1491_v10 = vadd.f32 1.0, %v2415_v19  ;;  %v1426_v36 = vmul.f32 1.442695, %v1316_v38  ;;  %v1153_v60 = vmul.f32 %v3196_v44, %v1085_v8 }
 0x146   : > { %v2419_v39 = vpop.eup %2418  ;;  %1731 = vst.msk [vmem:[%s2910_s30 + $0x30] sm:$0xf] %vm1718_vm4, %v1666_v61  ;;  %v1698_v55 = vpack.c.bf16 %v1634_v42, %v1634_v42  ;;  %v1507_v45 = vadd.f32 1.0, %v2417_v24  ;;  %2426 = vpow2.f32 %v1394_v40  ;;  %v1458_v23 = vmul.f32 1.442695, %v1332_v41 }
 0x147   : > { %v2421_v34 = vpop.eup %2420  ;;  %1747 = vst.msk [vmem:[%s2910_s30 + $0x70] sm:$0xf] %vm1718_vm4, %v1682_v5  ;;  %v1650_v50 = vmul.f32 %v2419_v39, %v3456_v11  ;;  %2428 = vrcp.f32 %v1491_v10  ;;  %v3539_v9 = vadd.f32 %v3204_v58, %v1153_v60  ;;  %v969_v44 = vadd.f32 %v855_v2, %v393_v33 }
 0x148   : > { %v2423_v31 = vpop.eup %2422  ;;  %1763 = vst.msk [vmem:[%s2910_s30 + $0xb0] sm:$0xf] %vm1718_vm4, %v1698_v55  ;;  %2430 = vrcp.f32 %v1507_v45  ;;  %v1523_v12 = vadd.f32 1.0, %v2421_v34  ;;  %v985_v46 = vadd.f32 %v895_v27, %v409_v6  ;;  %v1001_v49 = vadd.f32 %v935_v15, %v425_v35 }
 0x149   : > { %v2425_v25 = vpop.eup %2424  ;;  %v1714_v32 = vpack.c.bf16 %v1650_v50, %v1650_v50  ;;  %v1603_v29 = vmul.f32 %v2423_v31, %v3467_v43  ;;  %2432 = vpow2.f32 %v1426_v36  ;;  %v1285_v11 = vsub.f32 0.0, %v3539_v9  ;;  %1034 = vst.msk [vmem:[#allocation2 + $0xf8] sm:$0xff] %vm297_vm3, %v969_v44 }
 0x14a   : > { %2434 = vrcp.f32 %v1523_v12  ;;  %v1476_v58 = vadd.f32 1.0, %v2425_v25  ;;  %1050 = vst.msk [vmem:[#allocation2 + $0x178] sm:$0xff] %vm297_vm3, %v985_v46 }
 0x14b   : > { %1779 = vst.msk [vmem:[%s2910_s30 + $0xf0] sm:$0xf] %vm1718_vm4, %v1714_v32  ;;  %v1667_v56 = vpack.c.bf16 %v1603_v29, %v1603_v29  ;;  %2436 = vpow2.f32 %v1458_v23  ;;  %v1364_v52 = vmul.f32 1.442695, %v1285_v11 }
 0x14c   : > { %v2427_v3 = vpop.eup %2426  ;;  %2438 = vrcp.f32 %v1476_v58  ;;  %1066 = vst.msk [vmem:[#allocation2 + $0x1f8] sm:$0xff] %vm297_vm3, %v1001_v49 }
 0x14d   : > { %v2429_v26 = vpop.eup %2428  ;;  %1732 = vst.msk [vmem:[%s2910_s30 + $0x34] sm:$0xf] %vm1718_vm4, %v1667_v56  ;;  %v1492_v43 = vadd.f32 1.0, %v2427_v3  ;;  %2440 = vpow2.f32 %v1364_v52 }
 0x14e   : > { %v2431_v4 = vpop.eup %2430  ;;  %v1619_v30 = vmul.f32 %v2429_v26, %v3483_v59 }
 0x14f   : > { %v2433_v21 = vpop.eup %2432  ;;  %v1635_v48 = vmul.f32 %v2431_v4, %v3486_v57  ;;  %2442 = vrcp.f32 %v1492_v43 }
 0x150   : > { %v2435_v37 = vpop.eup %2434  ;;  %v1683_v63 = vpack.c.bf16 %v1619_v30, %v1619_v30  ;;  %v1508_v28 = vadd.f32 1.0, %v2433_v21  ;;  %v1101_v51 = vld [vmem:[#allocation2 + $0xf8] sm:$0xff] }
 0x151   : > { %v2437_v1 = vpop.eup %2436  ;;  %v1699_v18 = vpack.c.bf16 %v1635_v48, %v1635_v48  ;;  %v1651_v13 = vmul.f32 %v2435_v37, %v3491_v53  ;;  %v1169_v16 = vmul.f32 %v2464_v22, %v1101_v51  ;;  %v1117_v20 = vld [vmem:[#allocation2 + $0x178] sm:$0xff]  ;;  %v2465_v53 = vld [vmem:[%s3630_s3] ss:$0 sm:$0xff] }
 0x152   : > { %v2439_v59 = vpop.eup %2438  ;;  %1748 = vst.msk [vmem:[%s2910_s30 + $0x74] sm:$0xf] %vm1718_vm4, %v1683_v63  ;;  %2444 = vrcp.f32 %v1508_v28  ;;  %v1524_v57 = vadd.f32 1.0, %v2437_v1  ;;  %v1185_v8 = vmul.f32 %v2464_v22, %v1117_v20 }
 0x153   : > { %v2441_v47 = vpop.eup %2440  ;;  %1764 = vst.msk [vmem:[%s2910_s30 + $0xb4] sm:$0xf] %vm1718_vm4, %v1699_v18  ;;  %v1715_v62 = vpack.c.bf16 %v1651_v13, %v1651_v13  ;;  %v1604_v54 = vmul.f32 %v2439_v59, %v3504_v14  ;;  %v1237_v38 = vadd.f32 %v2465_v53, %v1169_v16  ;;  %v1133_v19 = vld [vmem:[#allocation2 + $0x1f8] sm:$0xff] }
 0x154   : > { %2446 = vrcp.f32 %v1524_v57  ;;  %v1477_v61 = vadd.f32 1.0, %v2441_v47  ;;  %v1253_v42 = vadd.f32 %v2465_v53, %v1185_v8  ;;  %v1201_v40 = vmul.f32 %v2464_v22, %v1133_v19 }
 0x155   : > { %v2443_v41 = vpop.eup %2442  ;;  %1780 = vst.msk [vmem:[%s2910_s30 + $0xf4] sm:$0xf] %vm1718_vm4, %v1715_v62  ;;  %v1668_v33 = vpack.c.bf16 %v1604_v54, %v1604_v54  ;;  %v1301_v2 = vsub.f32 0.0, %v1237_v38 }
 0x156   : > { %v1620_v6 = vmul.f32 %v2443_v41, %v3512_v7  ;;  %2448 = vrcp.f32 %v1477_v61  ;;  %v1317_v14 = vsub.f32 0.0, %v1253_v42  ;;  %v1269_v24 = vadd.f32 %v2465_v53, %v1201_v40 }
 0x157   : > { %1733 = vst.msk [vmem:[%s2910_s30 + $0x38] sm:$0xf] %vm1718_vm4, %v1668_v33  ;;  %v1396_v5 = vmul.f32 1.442695, %v1301_v2 }
 0x158   : > { %v2445_v10 = vpop.eup %2444  ;;  %v1684_v36 = vpack.c.bf16 %v1620_v6, %v1620_v6  ;;  %v1428_v60 = vmul.f32 1.442695, %v1317_v14  ;;  %v1333_v27 = vsub.f32 0.0, %v1269_v24 }
 0x159   : > { %v1636_v35 = vmul.f32 %v2445_v10, %v3519_v0  ;;  %2450 = vpow2.f32 %v1396_v5 }
 0x15a   : > { %v2447_v15 = vpop.eup %2446  ;;  %1749 = vst.msk [vmem:[%s2910_s30 + $0x78] sm:$0xf] %vm1718_vm4, %v1684_v36  ;;  %2452 = vpow2.f32 %v1428_v60  ;;  %v1460_v7 = vmul.f32 1.442695, %v1333_v27 }
 0x15b   : > { %v1700_v39 = vpack.c.bf16 %v1636_v35, %v1636_v35  ;;  %v1652_v55 = vmul.f32 %v2447_v15, %v3524_v17 }
 0x15c   : > { %v2449_v45 = vpop.eup %2448  ;;  %2454 = vpow2.f32 %v1460_v7 }
 0x15d   : > { %1765 = vst.msk [vmem:[%s2910_s30 + $0xb8] sm:$0xf] %vm1718_vm4, %v1700_v39  ;;  %v1716_v23 = vpack.c.bf16 %v1652_v55, %v1652_v55  ;;  %v1605_v34 = vmul.f32 %v2449_v45, %v3539_v9 }
 0x15f   : > { %v2451_v50 = vpop.eup %2450  ;;  %1781 = vst.msk [vmem:[%s2910_s30 + $0xf8] sm:$0xf] %vm1718_vm4, %v1716_v23  ;;  %v1669_v0 = vpack.c.bf16 %v1605_v34, %v1605_v34 }
 0x160   : > { %v2453_v44 = vpop.eup %2452  ;;  %v1493_v31 = vadd.f32 1.0, %v2451_v50 }
 0x161   : > { %1734 = vst.msk [vmem:[%s2910_s30 + $0x3c] sm:$0xf] %vm1718_vm4, %v1669_v0  ;;  %v1509_v12 = vadd.f32 1.0, %v2453_v44 }
 0x162   : > { %v2455_v46 = vpop.eup %2454  ;;  %2456 = vrcp.f32 %v1493_v31 }
 0x163   : > { %2458 = vrcp.f32 %v1509_v12  ;;  %v1525_v17 = vadd.f32 1.0, %v2455_v46 }
 0x165   : > { %2460 = vrcp.f32 %v1525_v17 }
 0x168   : > { %v2457_v9 = vpop.eup %2456 }
 0x169   : > { %v2459_v49 = vpop.eup %2458  ;;  %v1621_v25 = vmul.f32 %v2457_v9, %v1237_v38 }
 0x16a   : > { %v1637_v32 = vmul.f32 %v2459_v49, %v1253_v42 }
 0x16b   : > { %v2461_v29 = vpop.eup %2460  ;;  %v1685_v11 = vpack.c.bf16 %v1621_v25, %v1621_v25 }
 0x16c   : > { %v1701_v58 = vpack.c.bf16 %v1637_v32, %v1637_v32  ;;  %v1653_v56 = vmul.f32 %v2461_v29, %v1269_v24 }
 0x16d   : > { %1750 = vst.msk [vmem:[%s2910_s30 + $0x7c] sm:$0xf] %vm1718_vm4, %v1685_v11 }
 0x16e   : > { %1766 = vst.msk [vmem:[%s2910_s30 + $0xbc] sm:$0xf] %vm1718_vm4, %v1701_v58  ;;  %v1717_v52 = vpack.c.bf16 %v1653_v56, %v1653_v56 }
 0x170   : > { %1782 = vst.msk [vmem:[%s2910_s30 + $0xfc] sm:$0xf] %vm1718_vm4, %v1717_v52 }
 0x171   : > { %2493 = shalt.err (!%p2490_p5)
}
 0x172   : > { %s2548_s26 = smov 64   ;;  %s2549_s30 = smov 4  }
 0x173   : > { %2145 = dma.vmem_to_hbm [thread:$0]  (%p2615_p4), %s1798_s24, 4096, %s1800_s29, %s1784_s18, %s2548_s26, %s2548_s26, %s2549_s30  }
 0x174 PF: > { %p2151_p6 = scmp.ge.s32.totalorder %s2544_s20, 2  ;;  %s1814_s12 = sand.u32 1, %s2524_s15  }
 0x175   : > { %s1815_s13 = scalar_lea.sflag [#allocation4], %s1814_s12 }
 0x176   : > { %p2148_p7 = pnand %p2151_p6, %p2622_p8 }
 0x178   : > { %p2149_p9 = pneg %p2148_p7 }
 0x17a   : > { %2519 = dma.done.wait (%p2149_p9), %s1815_s13, 4096  }
 0x17b   : > { %2521 = vsyncadd (%p2149_p9), %s1815_s13, 4294963200  ;;  %s17_s20 = sadd.s32 1, %s2544_s20   ;;  %s3634_s15 = smov %s2528_s16 }
 0x17c   : > { %p14_p10 = scmp.ge.s32.totalorder %s17_s20, 6   ;;  %s3635_s16 = smov %s2532_s17 }
 0x17d   : > { %s3636_s17 = smov %s2628_s28  ;;  %s3637_s18 = smov %s2540_s19 }
 0x17e   : > { %s3638_s19 = smov %s3640_s23  ;;  %16 = sbr.rel (!%p14_p10) target bundleno = 4 (0x4), region = 88 }
 0x183   :  { %1821 = vsyncpa [#allocation4], 1 }
 0x184   :  { %1823 = vsyncpa [#allocation4 + $0x1], 1 }

</bundles_post_ra>
